<compile_context>
chip_gen: v7x
topology: tpu7x:2x2x1
jax: 0.10.0
libtpu: 0.0.40
codegen_flags: <defaults>
</compile_context>

<pallas_src>
import functools

import jax
import jax.numpy as jnp
from jax import lax
from jax.experimental import pallas as pl
from jax.experimental.pallas import tpu as pltpu

SEQ = 61            # BatchNorm1d(61): the BN channel axis is the sequence axis of length 61
BN_EPS = 1e-5
DROP_P = 0.1
_DROP_THRESHOLD = int(DROP_P * (1 << 32))   # drop iff hash < threshold  (keep prob = 0.9)
_LANE = 128


def _lwbn_kernel(seed_ref, x_ref, wt_ref, b_ref, sel_ref, selt_ref, gamma_ref, beta_ref,
                 o_ref, *, n_valid):
    """Fused Linear -> BatchNorm1d(61) (training stats) -> ReLU -> Dropout(0.1).

    x_ref:     (M, Din)  VMEM, M = B*61, rows are (b, s) pairs, b-major
    wt_ref:    (Din, Dp) VMEM, linear weight transposed, zero-padded to lane-dense Dp
    b_ref:     (1, Dp)   VMEM, zero-padded bias
    sel_ref:   (S, M)    VMEM, sel[s, m] = 1.0 iff row m belongs to BN channel s
    selt_ref:  (M, S)    VMEM, transpose of sel (channel -> row broadcast)
    gamma_ref: (S, 1)    VMEM, BN affine weight
    beta_ref:  (S, 1)    VMEM, BN affine bias
    o_ref:     (M, Dp)   VMEM output (lane-dense)
    """
    # ---- Linear: one MXU matmul over all M rows, bias added once ----
    y = jnp.dot(x_ref[...], wt_ref[...], preferred_element_type=jnp.float32) + b_ref[...]

    # ---- BatchNorm1d(61), training-mode batch stats, single pass (sum & sumsq) ----
    # Per-channel strided row reduce expressed as a 0/1 selection matmul (MXU is idle here).
    sel = sel_ref[...]
    ch_sum = jnp.dot(sel, y, preferred_element_type=jnp.float32)          # (S, Dp)
    ch_sqs = jnp.dot(sel, y * y, preferred_element_type=jnp.float32)      # (S, Dp)
    inv_n = 1.0 / n_valid                                                 # padded lanes are 0
    mean = jnp.sum(ch_sum, axis=1, keepdims=True) * inv_n                 # (S, 1)
    var = jnp.sum(ch_sqs, axis=1, keepdims=True) * inv_n - mean * mean    # biased variance
    var = jnp.maximum(var, 0.0)                                           # guard cancellation
    scale_s = gamma_ref[...] * lax.rsqrt(var + BN_EPS)                    # (S, 1)
    shift_s = beta_ref[...] - mean * scale_s                              # (S, 1)

    # Broadcast per-channel scale/shift back to rows (row m -> channel m % 61).
    selt = selt_ref[...]
    row_scale = jnp.dot(selt, scale_s, preferred_element_type=jnp.float32)  # (M, 1)
    row_shift = jnp.dot(selt, shift_s, preferred_element_type=jnp.float32)  # (M, 1)

    # ---- BN affine + ReLU (one FMA-style pass over the tensor) ----
    y = jnp.maximum(y * row_scale + row_shift, 0.0)

    # ---- Dropout(0.1): integer-threshold keep mask from a per-element counter hash ----
    # (pure uint32 VPU ops; random stream differs from torch but keep prob / scaling match)
    rows = lax.broadcasted_iota(jnp.uint32, y.shape, 0)
    cols = lax.broadcasted_iota(jnp.uint32, y.shape, 1)
    h = (rows * jnp.uint32(y.shape[1]) + cols) * jnp.uint32(0x9E3779B9)
    h = h + seed_ref[0].astype(jnp.uint32)
    h = h ^ (h >> 16)
    h = h * jnp.uint32(0x7FEB352D)
    h = h ^ (h >> 15)
    h = h * jnp.uint32(0x846CA68B)
    h = h ^ (h >> 16)
    keep = h >= jnp.uint32(_DROP_THRESHOLD)
    o_ref[...] = jnp.where(keep, y * (1.0 / (1.0 - DROP_P)), 0.0).astype(o_ref.dtype)


def linear_with_batchnorm(x, w, b, gamma, beta, seed=0):
    """x: (B, 61, Din) f32; w: (Dout, Din); b: (Dout,); gamma/beta: (61,) -> (B, 61, Dout)."""
    B, S, Din = x.shape
    Dout, Din_w = w.shape
    assert S == SEQ, f"BatchNorm1d(61) requires sequence length {SEQ}, got {S}"
    assert Din_w == Din

    M = B * S
    Dp = ((Dout + _LANE - 1) // _LANE) * _LANE          # lane-dense padded output width

    # Wrapper-side layout plumbing (all contiguous / cheap XLA ops).
    x2d = jnp.asarray(x, jnp.float32).reshape(M, Din)
    wt = jnp.asarray(w, jnp.float32).T                  # (Din, Dout)
    wt = jnp.pad(wt, ((0, 0), (0, Dp - Dout)))          # zero cols -> padded lanes stay 0
    bias = jnp.pad(jnp.asarray(b, jnp.float32), (0, Dp - Dout)).reshape(1, Dp)
    gamma_s = jnp.asarray(gamma, jnp.float32).reshape(S, 1)
    beta_s = jnp.asarray(beta, jnp.float32).reshape(S, 1)

    # 0/1 selection matrices mapping flattened rows (m = b*S + s) <-> BN channels s.
    ch_of_row = jnp.arange(M, dtype=jnp.int32) % S
    sel = (jnp.arange(S, dtype=jnp.int32)[:, None] == ch_of_row[None, :]).astype(jnp.float32)
    selt = sel.T

    seed_arr = jnp.asarray([seed], dtype=jnp.int32)

    kernel = functools.partial(_lwbn_kernel, n_valid=float(B * Dout))

    # Advisory cost + explicit VMEM budget (everything is resident in a single block).
    flops = 2 * M * Din * Dp + 2 * (2 * S * M * Dp) + 2 * (2 * M * S) + 12 * M * Dp
    buf_bytes = 4 * (M * Din + Din * Dp + Dp + 2 * S * M + 2 * S + M * Dp)
    vmem_limit = int(min(max(3 * buf_bytes, 16 * 1024 * 1024), 96 * 1024 * 1024))

    out2d = pl.pallas_call(
        kernel,
        out_shape=jax.ShapeDtypeStruct((M, Dp), jnp.float32),
        in_specs=[
            pl.BlockSpec(memory_space=pltpu.MemorySpace.SMEM),   # seed (scalar)
            pl.BlockSpec(memory_space=pltpu.MemorySpace.VMEM),   # x (M, Din)
            pl.BlockSpec(memory_space=pltpu.MemorySpace.VMEM),   # w^T padded (Din, Dp)
            pl.BlockSpec(memory_space=pltpu.MemorySpace.VMEM),   # bias padded (1, Dp)
            pl.BlockSpec(memory_space=pltpu.MemorySpace.VMEM),   # sel (S, M)
            pl.BlockSpec(memory_space=pltpu.MemorySpace.VMEM),   # sel^T (M, S)
            pl.BlockSpec(memory_space=pltpu.MemorySpace.VMEM),   # gamma (S, 1)
            pl.BlockSpec(memory_space=pltpu.MemorySpace.VMEM),   # beta (S, 1)
        ],
        out_specs=pl.BlockSpec(memory_space=pltpu.MemorySpace.VMEM),
        compiler_params=pltpu.CompilerParams(vmem_limit_bytes=vmem_limit),
        cost_estimate=pl.CostEstimate(flops=flops, transcendentals=S,
                                      bytes_accessed=buf_bytes),
    )(seed_arr, x2d, wt, bias, sel, selt, gamma_s, beta_s)

    # Drop padded lanes and restore the module's (B, 61, Dout) output shape.
    return out2d[:, :Dout].reshape(B, S, Dout)


if __name__ == "__main__":
    B, Din, Dout = 4, 32, 64
    key = jax.random.PRNGKey(0)
    kx, kw, kb = jax.random.split(key, 3)

    x = jax.random.normal(kx, (B, SEQ, Din), jnp.float32)

    # Deterministic parameter init (nn.Linear-style uniform bounds; BN defaults).
    bound = 1.0 / (Din ** 0.5)
    w = jax.random.uniform(kw, (Dout, Din), jnp.float32, -bound, bound)
    b = jax.random.uniform(kb, (Dout,), jnp.float32, -bound, bound)
    gamma = jnp.ones((SEQ,), jnp.float32)
    beta = jnp.zeros((SEQ,), jnp.float32)

    out = jax.block_until_ready(linear_with_batchnorm(x, w, b, gamma, beta, seed=0))

    assert out.shape == (B, SEQ, Dout)
    assert bool(jnp.all(jnp.isfinite(out)))

    # Pure-JAX reference for the deterministic part (Linear -> BN train -> ReLU); dropout
    # elements that were kept must equal ref / 0.9, dropped ones are exactly zero.
    y_ref = jnp.einsum("bsi,oi->bso", x, w) + b
    mean = y_ref.mean(axis=(0, 2), keepdims=True)
    var = ((y_ref - mean) ** 2).mean(axis=(0, 2), keepdims=True)
    y_ref = (y_ref - mean) * lax.rsqrt(var + BN_EPS)
    y_ref = jnp.maximum(y_ref * gamma[None, :, None] + beta[None, :, None], 0.0)
    kept = out != 0
    assert bool(jnp.allclose(jnp.where(kept, out * (1.0 - DROP_P), 0.0),
                             jnp.where(kept, y_ref, 0.0), atol=1e-2, rtol=1e-2))

    print("KERNEL_OK")
</pallas_src>

<mosaic_0001>
module attributes {stable_mosaic.version = 11 : i64} {
  func.func @_lwbn_kernel(%arg0: memref<1xi32, #tpu.memory_space<smem>>, %arg1: memref<244x32xf32, #tpu.memory_space<vmem>>, %arg2: memref<32x128xf32, #tpu.memory_space<vmem>>, %arg3: memref<1x128xf32, #tpu.memory_space<vmem>>, %arg4: memref<61x244xf32, #tpu.memory_space<vmem>>, %arg5: memref<244x61xf32, #tpu.memory_space<vmem>>, %arg6: memref<61x1xf32, #tpu.memory_space<vmem>>, %arg7: memref<61x1xf32, #tpu.memory_space<vmem>>, %arg8: memref<244x128xf32, #tpu.memory_space<vmem>>) attributes {dimension_semantics = [], scalar_prefetch = 0 : i64, scratch_operands = 0 : i64, tpu.core_type = #tpu.core_type<tc>} {
    %c0 = arith.constant 0 : index
    %c0_0 = arith.constant 0 : index
    %0 = vector.load %arg1[%c0, %c0_0] : memref<244x32xf32, #tpu.memory_space<vmem>>, vector<244x32xf32>
    %c0_1 = arith.constant 0 : index
    %c0_2 = arith.constant 0 : index
    %1 = vector.load %arg2[%c0_1, %c0_2] : memref<32x128xf32, #tpu.memory_space<vmem>>, vector<32x128xf32>
    %cst = arith.constant dense<0.000000e+00> : vector<244x128xf32>
    %2 = tpu.matmul %0, %1, %cst {dimension_numbers = #tpu.dot_dimension_numbers<[1], [0], [0], [1], [0, 0, 1, 1], [], []>} : vector<244x32xf32>, vector<32x128xf32>, vector<244x128xf32> -> vector<244x128xf32>
    %c0_3 = arith.constant 0 : index
    %c0_4 = arith.constant 0 : index
    %3 = vector.load %arg3[%c0_3, %c0_4] : memref<1x128xf32, #tpu.memory_space<vmem>>, vector<1x128xf32>
    %4 = vector.broadcast %3 : vector<1x128xf32> to vector<244x128xf32>
    %5 = arith.addf %2, %4 : vector<244x128xf32>
    %c0_5 = arith.constant 0 : index
    %c0_6 = arith.constant 0 : index
    %6 = vector.load %arg4[%c0_5, %c0_6] : memref<61x244xf32, #tpu.memory_space<vmem>>, vector<61x244xf32>
    %cst_7 = arith.constant dense<0.000000e+00> : vector<61x128xf32>
    %7 = tpu.matmul %6, %5, %cst_7 {dimension_numbers = #tpu.dot_dimension_numbers<[1], [0], [0], [1], [0, 0, 1, 1], [], []>} : vector<61x244xf32>, vector<244x128xf32>, vector<61x128xf32> -> vector<61x128xf32>
    %8 = arith.mulf %5, %5 : vector<244x128xf32>
    %cst_8 = arith.constant dense<0.000000e+00> : vector<61x128xf32>
    %9 = tpu.matmul %6, %8, %cst_8 {dimension_numbers = #tpu.dot_dimension_numbers<[1], [0], [0], [1], [0, 0, 1, 1], [], []>} : vector<61x244xf32>, vector<244x128xf32>, vector<61x128xf32> -> vector<61x128xf32>
    %cst_9 = arith.constant dense<0.000000e+00> : vector<61xf32>
    %10 = vector.multi_reduction <add>, %7, %cst_9 [1] : vector<61x128xf32> to vector<61xf32>
    %11 = vector.shape_cast %10 : vector<61xf32> to vector<61x1xf32>
    %cst_10 = arith.constant 3.906250e-03 : f32
    %12 = vector.broadcast %cst_10 : f32 to vector<61x1xf32>
    %13 = arith.mulf %11, %12 : vector<61x1xf32>
    %cst_11 = arith.constant dense<0.000000e+00> : vector<61xf32>
    %14 = vector.multi_reduction <add>, %9, %cst_11 [1] : vector<61x128xf32> to vector<61xf32>
    %15 = vector.shape_cast %14 : vector<61xf32> to vector<61x1xf32>
    %cst_12 = arith.constant 3.906250e-03 : f32
    %16 = vector.broadcast %cst_12 : f32 to vector<61x1xf32>
    %17 = arith.mulf %15, %16 : vector<61x1xf32>
    %18 = arith.mulf %13, %13 : vector<61x1xf32>
    %19 = arith.subf %17, %18 : vector<61x1xf32>
    %cst_13 = arith.constant 0.000000e+00 : f32
    %20 = vector.broadcast %cst_13 : f32 to vector<61x1xf32>
    %21 = arith.maximumf %19, %20 : vector<61x1xf32>
    %c0_14 = arith.constant 0 : index
    %c0_15 = arith.constant 0 : index
    %22 = vector.load %arg6[%c0_14, %c0_15] : memref<61x1xf32, #tpu.memory_space<vmem>>, vector<61x1xf32>
    %cst_16 = arith.constant 9.99999974E-6 : f32
    %23 = vector.broadcast %cst_16 : f32 to vector<61x1xf32>
    %24 = arith.addf %21, %23 : vector<61x1xf32>
    %25 = math.rsqrt %24 : vector<61x1xf32>
    %26 = arith.mulf %22, %25 : vector<61x1xf32>
    %c0_17 = arith.constant 0 : index
    %c0_18 = arith.constant 0 : index
    %27 = vector.load %arg7[%c0_17, %c0_18] : memref<61x1xf32, #tpu.memory_space<vmem>>, vector<61x1xf32>
    %28 = arith.mulf %13, %26 : vector<61x1xf32>
    %29 = arith.subf %27, %28 : vector<61x1xf32>
    %c0_19 = arith.constant 0 : index
    %c0_20 = arith.constant 0 : index
    %30 = vector.load %arg5[%c0_19, %c0_20] : memref<244x61xf32, #tpu.memory_space<vmem>>, vector<244x61xf32>
    %cst_21 = arith.constant dense<0.000000e+00> : vector<244x1xf32>
    %31 = tpu.matmul %30, %26, %cst_21 {dimension_numbers = #tpu.dot_dimension_numbers<[1], [0], [0], [1], [0, 0, 1, 1], [], []>} : vector<244x61xf32>, vector<61x1xf32>, vector<244x1xf32> -> vector<244x1xf32>
    %cst_22 = arith.constant dense<0.000000e+00> : vector<244x1xf32>
    %32 = tpu.matmul %30, %29, %cst_22 {dimension_numbers = #tpu.dot_dimension_numbers<[1], [0], [0], [1], [0, 0, 1, 1], [], []>} : vector<244x61xf32>, vector<61x1xf32>, vector<244x1xf32> -> vector<244x1xf32>
    %33 = vector.broadcast %31 : vector<244x1xf32> to vector<244x128xf32>
    %34 = arith.mulf %5, %33 : vector<244x128xf32>
    %35 = vector.broadcast %32 : vector<244x1xf32> to vector<244x128xf32>
    %36 = arith.addf %34, %35 : vector<244x128xf32>
    %cst_23 = arith.constant 0.000000e+00 : f32
    %37 = vector.broadcast %cst_23 : f32 to vector<244x128xf32>
    %38 = arith.maximumf %36, %37 : vector<244x128xf32>
    %39 = tpu.iota {dimensions = array<i32: 0>} : vector<244x128xi32>
    %40 = tpu.iota {dimensions = array<i32: 1>} : vector<244x128xi32>
    %c128_i32 = arith.constant 128 : i32
    %41 = vector.broadcast %c128_i32 : i32 to vector<244x128xi32>
    %42 = arith.muli %39, %41 : vector<244x128xi32>
    %43 = arith.addi %42, %40 : vector<244x128xi32>
    %c-1640531527_i32 = arith.constant -1640531527 : i32
    %44 = vector.broadcast %c-1640531527_i32 : i32 to vector<244x128xi32>
    %45 = arith.muli %43, %44 : vector<244x128xi32>
    %c0_24 = arith.constant 0 : index
    %46 = memref.load %arg0[%c0_24] : memref<1xi32, #tpu.memory_space<smem>>
    %47 = vector.broadcast %46 : i32 to vector<244x128xi32>
    %48 = arith.addi %45, %47 : vector<244x128xi32>
    %c16_i32 = arith.constant 16 : i32
    %49 = vector.broadcast %c16_i32 : i32 to vector<244x128xi32>
    %50 = arith.shrui %48, %49 : vector<244x128xi32>
    %51 = arith.xori %48, %50 : vector<244x128xi32>
    %c2146121005_i32 = arith.constant 2146121005 : i32
    %52 = vector.broadcast %c2146121005_i32 : i32 to vector<244x128xi32>
    %53 = arith.muli %51, %52 : vector<244x128xi32>
    %c15_i32 = arith.constant 15 : i32
    %54 = vector.broadcast %c15_i32 : i32 to vector<244x128xi32>
    %55 = arith.shrui %53, %54 : vector<244x128xi32>
    %56 = arith.xori %53, %55 : vector<244x128xi32>
    %c-2073254261_i32 = arith.constant -2073254261 : i32
    %57 = vector.broadcast %c-2073254261_i32 : i32 to vector<244x128xi32>
    %58 = arith.muli %56, %57 : vector<244x128xi32>
    %c16_i32_25 = arith.constant 16 : i32
    %59 = vector.broadcast %c16_i32_25 : i32 to vector<244x128xi32>
    %60 = arith.shrui %58, %59 : vector<244x128xi32>
    %61 = arith.xori %58, %60 : vector<244x128xi32>
    %c429496729_i32 = arith.constant 429496729 : i32
    %62 = vector.broadcast %c429496729_i32 : i32 to vector<244x128xi32>
    %63 = arith.cmpi uge, %61, %62 : vector<244x128xi32>
    %cst_26 = arith.constant 1.11111116 : f32
    %64 = vector.broadcast %cst_26 : f32 to vector<244x128xf32>
    %65 = arith.mulf %38, %64 : vector<244x128xf32>
    %cst_27 = arith.constant 0.000000e+00 : f32
    %66 = vector.broadcast %cst_27 : f32 to vector<244x128xf32>
    %67 = arith.select %63, %65, %66 : vector<244x128xi1>, vector<244x128xf32>
    %c0_28 = arith.constant 0 : index
    %c0_29 = arith.constant 0 : index
    %68 = vector.load %arg8[%c0_28, %c0_29] : memref<244x128xf32, #tpu.memory_space<vmem>>, vector<244x128xf32>
    tpu.vector_store %arg8[%c0_28, %c0_29], %67 {strides = array<i32>} : memref<244x128xf32, #tpu.memory_space<vmem>>, vector<244x128xf32>,
    return
  }
}

</mosaic_0001>

<bundles_post_ra>
// kernel: tpu_custom_call.1
= control target key start
LH: loop header
LB: loop body
LE: loop exit
PB: predicated region body
PF: predicated region fallthrough
CT: control target
= control target key end

     0   :  { %v3055_v3 = vmov 0.0|0.0   ;;  %vm3056_vm0 = vmmov 0   ;;  %v3057_v6 = vmov 0.0   ;;  %vm73_vm1 = vcmask 261120   ;;  %s4399_s0 = inlined_call_operand.<no memory space> [shape: s32[1], index: 0, kind: input, shape index: {}]   ;;  %s4400_s1 = inlined_call_operand.vmem [shape: f32[244,32], index: 1, kind: input, shape index: {}]   ;;  %s4401_s2 = inlined_call_operand.vmem [shape: f32[32,128], index: 2, kind: input, shape index: {}]   ;;  %s4402_s3 = inlined_call_operand.vmem [shape: f32[1,128], index: 3, kind: input, shape index: {}]   ;;  %s4403_s4 = inlined_call_operand.vmem [shape: f32[61,244], index: 4, kind: input, shape index: {}]   ;;  %s4404_s5 = inlined_call_operand.vmem [shape: f32[244,61], index: 5, kind: input, shape index: {}]   ;;  %s4405_s6 = inlined_call_operand.vmem [shape: f32[61,1], index: 6, kind: input, shape index: {}]   ;;  %s4406_s7 = inlined_call_operand.vmem [shape: f32[61,1], index: 7, kind: input, shape index: {}]   ;;  %s4407_s8 = inlined_call_operand.hbm [shape: f32[244,128], index: 8, kind: output, shape index: {}]  }
   0x1   :  { %v62_v0 = vld [vmem:[%s4401_s2] sm:$0xff]  ;;  %v63_v1 = vld [vmem:[%s4401_s2 + $0x8] sm:$0xff]  ;;  %v64_v2 = vld [vmem:[%s4401_s2 + $0x10] sm:$0xff]  ;;  %2875 = vmatprep.subr.bf16.mxu0 %v3055_v3  ;;  %2564 = vmatprep.mubr.msk.f32.mxu0 %vm3056_vm0, %v3057_v6 }
   0x2   :  { %v2876_v4 = vpack.c.bf16 %v63_v1, %v62_v0  ;;  %v65_v5 = vld [vmem:[%s4401_s2 + $0x18] sm:$0xff]  ;;  %2881 = vmatprep.subr.bf16.mxu1 %v3055_v3  ;;  %v31_v8 = vld [vmem:[%s4400_s1] sm:$0xff]  ;;  %v32_v9 = vld [vmem:[%s4400_s1 + $0x8] sm:$0xff] }
   0x3   :  { %v2879_v7 = vpack.c.bf16 %v65_v5, %v64_v2 }
   0x4   :  { %2877 = vmatpush3.bf16.msra.mxu0 %v2876_v4 }
   0x5   :  { %2878 = vmatprep.subr.bf16.mxu0 %v3055_v3 }
   0x8   :  { %2880 = vmatpush3.bf16.msra.mxu0 %v2879_v7 }
   0x9   :  { %2971 = vmatprep.subr.bf16.mxu0 %v3055_v3 }
   0xb   :  { %2565 = vmatmul.mubr.msk.f32.vlgmr.msra.gmra.mrb[0].mxu0 %vm73_vm1, %v31_v8 }
   0xc   :  { %2567 = vmatprep.mubr.msk.f32.mxu0 %vm3056_vm0, %v3057_v6 }
   0xd   :  { %14 = vsyncpa [#allocation4], 0  ;;  %v33_v10 = vld [vmem:[%s4400_s1 + $0x10] sm:$0xff]  ;;  %v34_v11 = vld [vmem:[%s4400_s1 + $0x18] sm:$0xff]  ;;  %vm403_vm2 = vcmask 949248   ;;  %vm428_vm3 = vcmask 1043456  }
   0xe   :  { %v35_v12 = vld [vmem:[%s4400_s1 + $0x20] sm:$0xff]  ;;  %v36_v13 = vld [vmem:[%s4400_s1 + $0x28] sm:$0xff]  ;;  %v37_v14 = vld [vmem:[%s4400_s1 + $0x30] sm:$0xff]  ;;  %vm690_vm4 = vcmask 1044480   ;;  %vm3058_vm5 = vmmov 1   ;;  %vm838_vm7 = vcmask 498688  }
   0xf   :  { %2568 = vmatmul.mubr.msk.f32.gmra.mrb[2].mxu0 %vm73_vm1, %v32_v9  ;;  %v38_v15 = vld [vmem:[%s4400_s1 + $0x38] sm:$0xff]  ;;  %v39_v16 = vld [vmem:[%s4400_s1 + $0x40] sm:$0xff]  ;;  %v40_v17 = vld [vmem:[%s4400_s1 + $0x48] sm:$0xff] }
  0x10   :  { %2570 = vmatprep.mubr.msk.f32.mxu0 %vm3056_vm0, %v3057_v6  ;;  %v41_v18 = vld [vmem:[%s4400_s1 + $0x50] sm:$0xff]  ;;  %v42_v19 = vld [vmem:[%s4400_s1 + $0x58] sm:$0xff]  ;;  %v43_v20 = vld [vmem:[%s4400_s1 + $0x60] sm:$0xff] }
  0x11   :  { %v44_v21 = vld [vmem:[%s4400_s1 + $0x68] sm:$0xff]  ;;  %v45_v22 = vld [vmem:[%s4400_s1 + $0x70] sm:$0xff]  ;;  %v46_v23 = vld [vmem:[%s4400_s1 + $0x78] sm:$0xff] }
  0x12   :  { %v47_v24 = vld [vmem:[%s4400_s1 + $0x80] sm:$0xff]  ;;  %v48_v25 = vld [vmem:[%s4400_s1 + $0x88] sm:$0xff]  ;;  %v49_v26 = vld [vmem:[%s4400_s1 + $0x90] sm:$0xff] }
  0x13   :  { %2571 = vmatmul.mubr.msk.f32.gmra.mrb[4].mxu0 %vm73_vm1, %v33_v10  ;;  %v50_v27 = vld [vmem:[%s4400_s1 + $0x98] sm:$0xff]  ;;  %v51_v28 = vld [vmem:[%s4400_s1 + $0xa0] sm:$0xff]  ;;  %v52_v29 = vld [vmem:[%s4400_s1 + $0xa8] sm:$0xff] }
  0x14   :  { %2573 = vmatprep.mubr.msk.f32.mxu0 %vm3056_vm0, %v3057_v6  ;;  %v53_v30 = vld [vmem:[%s4400_s1 + $0xb0] sm:$0xff]  ;;  %v54_v31 = vld [vmem:[%s4400_s1 + $0xb8] sm:$0xff]  ;;  %v55_v32 = vld [vmem:[%s4400_s1 + $0xc0] sm:$0xff] }
  0x15   :  { %v56_v33 = vld [vmem:[%s4400_s1 + $0xc8] sm:$0xff]  ;;  %v57_v34 = vld [vmem:[%s4400_s1 + $0xd0] sm:$0xff]  ;;  %v58_v35 = vld [vmem:[%s4400_s1 + $0xd8] sm:$0xff] }
  0x16   :  { %v59_v36 = vld [vmem:[%s4400_s1 + $0xe0] sm:$0xff]  ;;  %v60_v37 = vld [vmem:[%s4400_s1 + $0xe8] sm:$0xff]  ;;  %v61_v38 = vld [vmem:[%s4400_s1 + $0xf0] sm:$0xf] }
  0x17   :  { %2574 = vmatmul.mubr.msk.f32.gmra.mrb[6].mxu0 %vm73_vm1, %v34_v11  ;;  %v3315_v39 = vld [vmem:[%s4403_s4 + $0x8] sm:$0xff]  ;;  %v3322_v42 = vld [vmem:[%s4402_s3] ss:$0 sm:$0xff]  ;;  %vm3746_vm6 = vmpackc.low %vm690_vm4, %vm3058_vm5 }
  0x18   :  { %2576 = vmatprep.mubr.msk.f32.mxu0 %vm3056_vm0, %v3057_v6  ;;  %2362 = vmatprep.mubr.msk.f32.mxu1 %vm403_vm2, %v3315_v39 }
  0x1b   :  { %2577 = vmatmul.mubr.msk.f32.gmra.mrb[8].mxu0 %vm73_vm1, %v35_v12 }
  0x1c   :  { %2579 = vmatprep.mubr.msk.f32.mxu0 %vm3056_vm0, %v3057_v6 }
  0x1f   :  { %2580 = vmatmul.mubr.msk.f32.gmra.mrb[10].mxu0 %vm73_vm1, %v36_v13 }
  0x20   :  { %2582 = vmatprep.mubr.msk.f32.mxu0 %vm3056_vm0, %v3057_v6 }
  0x23   :  { %2583 = vmatmul.mubr.msk.f32.gmra.mrb[12].mxu0 %vm73_vm1, %v37_v14 }
  0x24   :  { %2585 = vmatprep.mubr.msk.f32.mxu0 %vm3056_vm0, %v3057_v6 }
  0x27   :  { %2586 = vmatmul.mubr.msk.f32.gmra.mrb[14].mxu0 %vm73_vm1, %v38_v15 }
  0x28   :  { %2588 = vmatprep.mubr.msk.f32.mxu0 %vm3056_vm0, %v3057_v6 }
  0x2b   :  { %2589 = vmatmul.mubr.msk.f32.gmra.mrb[16].mxu0 %vm73_vm1, %v39_v16 }
  0x2c   :  { %2591 = vmatprep.mubr.msk.f32.mxu0 %vm3056_vm0, %v3057_v6 }
  0x2f   :  { %2592 = vmatmul.mubr.msk.f32.gmra.mrb[18].mxu0 %vm73_vm1, %v40_v17 }
  0x30   :  { %2594 = vmatprep.mubr.msk.f32.mxu0 %vm3056_vm0, %v3057_v6 }
  0x33   :  { %2595 = vmatmul.mubr.msk.f32.gmra.mrb[20].mxu0 %vm73_vm1, %v41_v18 }
  0x34   :  { %2597 = vmatprep.mubr.msk.f32.mxu0 %vm3056_vm0, %v3057_v6 }
  0x37   :  { %2598 = vmatmul.mubr.msk.f32.gmra.mrb[22].mxu0 %vm73_vm1, %v42_v19 }
  0x38   :  { %2600 = vmatprep.mubr.msk.f32.mxu0 %vm3056_vm0, %v3057_v6 }
  0x3b   :  { %2601 = vmatmul.mubr.msk.f32.gmra.mrb[24].mxu0 %vm73_vm1, %v43_v20 }
  0x3c   :  { %2603 = vmatprep.mubr.msk.f32.mxu0 %vm3056_vm0, %v3057_v6 }
  0x3f   :  { %2604 = vmatmul.mubr.msk.f32.gmra.mrb[26].mxu0 %vm73_vm1, %v44_v21 }
  0x40   :  { %2606 = vmatprep.mubr.msk.f32.mxu0 %vm3056_vm0, %v3057_v6 }
  0x43   :  { %2607 = vmatmul.mubr.msk.f32.gmra.mrb[28].mxu0 %vm73_vm1, %v45_v22 }
  0x44   :  { %2609 = vmatprep.mubr.msk.f32.mxu0 %vm3056_vm0, %v3057_v6 }
  0x47   :  { %2610 = vmatmul.mubr.msk.f32.gmra.mrb[30].mxu0 %vm73_vm1, %v46_v23 }
  0x48   :  { %2612 = vmatprep.mubr.msk.f32.mxu0 %vm3056_vm0, %v3057_v6 }
  0x4b   :  { %2613 = vmatmul.mubr.msk.f32.gmra.mrb[32].mxu0 %vm73_vm1, %v47_v24 }
  0x4c   :  { %2615 = vmatprep.mubr.msk.f32.mxu0 %vm3056_vm0, %v3057_v6 }
  0x4f   :  { %2616 = vmatmul.mubr.msk.f32.gmra.mrb[34].mxu0 %vm73_vm1, %v48_v25 }
  0x50   :  { %2618 = vmatprep.mubr.msk.f32.mxu0 %vm3056_vm0, %v3057_v6 }
  0x53   :  { %2619 = vmatmul.mubr.msk.f32.gmra.mrb[36].mxu0 %vm73_vm1, %v49_v26 }
  0x54   :  { %2621 = vmatprep.mubr.msk.f32.mxu0 %vm3056_vm0, %v3057_v6 }
  0x57   :  { %2622 = vmatmul.mubr.msk.f32.gmra.mrb[38].mxu0 %vm73_vm1, %v50_v27 }
  0x58   :  { %2624 = vmatprep.mubr.msk.f32.mxu0 %vm3056_vm0, %v3057_v6 }
  0x5b   :  { %2625 = vmatmul.mubr.msk.f32.gmra.mrb[40].mxu0 %vm73_vm1, %v51_v28 }
  0x5c   :  { %2627 = vmatprep.mubr.msk.f32.mxu0 %vm3056_vm0, %v3057_v6 }
  0x5f   :  { %2628 = vmatmul.mubr.msk.f32.gmra.mrb[42].mxu0 %vm73_vm1, %v52_v29 }
  0x60   :  { %2630 = vmatprep.mubr.msk.f32.mxu0 %vm3056_vm0, %v3057_v6 }
  0x63   :  { %2631 = vmatmul.mubr.msk.f32.gmra.mrb[44].mxu0 %vm73_vm1, %v53_v30 }
  0x64   :  { %2633 = vmatprep.mubr.msk.f32.mxu0 %vm3056_vm0, %v3057_v6 }
  0x67   :  { %2634 = vmatmul.mubr.msk.f32.gmra.mrb[46].mxu0 %vm73_vm1, %v54_v31 }
  0x68   :  { %2636 = vmatprep.mubr.msk.f32.mxu0 %vm3056_vm0, %v3057_v6 }
  0x6b   :  { %2637 = vmatmul.mubr.msk.f32.gmra.mrb[48].mxu0 %vm73_vm1, %v55_v32 }
  0x6c   :  { %2639 = vmatprep.mubr.msk.f32.mxu0 %vm3056_vm0, %v3057_v6 }
  0x6f   :  { %2640 = vmatmul.mubr.msk.f32.gmra.mrb[50].mxu0 %vm73_vm1, %v56_v33 }
  0x70   :  { %2642 = vmatprep.mubr.msk.f32.mxu0 %vm3056_vm0, %v3057_v6 }
  0x73   :  { %2643 = vmatmul.mubr.msk.f32.gmra.mrb[52].mxu0 %vm73_vm1, %v57_v34 }
  0x74   :  { %2645 = vmatprep.mubr.msk.f32.mxu0 %vm3056_vm0, %v3057_v6 }
  0x77   :  { %2646 = vmatmul.mubr.msk.f32.gmra.mrb[54].mxu0 %vm73_vm1, %v58_v35 }
  0x78   :  { %2648 = vmatprep.mubr.msk.f32.mxu0 %vm3056_vm0, %v3057_v6 }
  0x7b   :  { %2649 = vmatmul.mubr.msk.f32.gmra.mrb[56].mxu0 %vm73_vm1, %v59_v36 }
  0x7c   :  { %2651 = vmatprep.mubr.msk.f32.mxu0 %vm3056_vm0, %v3057_v6 }
  0x7f   :  { %2652 = vmatmul.mubr.msk.f32.gmra.mrb[58].mxu0 %vm73_vm1, %v60_v37 }
  0x80   :  { %2654 = vmatprep.mubr.msk.f32.mxu0 %vm3056_vm0, %v3057_v6 }
  0x83   :  { %2655 = vmatmul.mubr.msk.f32.gmra.mrb[60].mxu0 %vm73_vm1, %v61_v38 }
  0x84   :  { %2673 = vmatprep.mubr.msk.f32.mxu0 %vm3056_vm0, %v3057_v6 }
  0xde   :  { %v233_v40 = vpop.f32.mrb[0].mxu0 }
  0xdf   :  { %v2566_v41 = vpop.f32.mrb[1].mxu0  ;;  %v3325_v44 = vadd.f32 %v3322_v42, %v233_v40 }
  0xe1   :  { %4416 = vst [vmem:[#allocation6_spill] sm:$0xff] %v3325_v44 }
  0xe2   :  { %v238_v43 = vpop.f32.mrb[2].mxu0 }
  0xe3   :  { %v3328_v45 = vadd.f32 %v3322_v42, %v238_v43  ;;  %v2569_v46 = vpop.f32.mrb[3].mxu0 }
  0xe5   :  { %4417 = vst [vmem:[#allocation7_spill] sm:$0xff] %v3328_v45  ;;  %v2882_v47 = vpack.c.bf16 %v3328_v45, %v3325_v44 }
  0xe6   :  { %v243_v48 = vpop.f32.mrb[4].mxu0 }
  0xe7   :  { %v2572_v49 = vpop.f32.mrb[5].mxu0  ;;  %2883 = vmatpush1.bf16.msra.mxu1 %v2882_v47  ;;  %v3334_v51 = vadd.f32 %v3322_v42, %v243_v48 }
  0xe8   :  { %2884 = vmatprep.subr.bf16.mxu1 %v3055_v3 }
  0xe9   :  { %4418 = vst [vmem:[#allocation8_spill] sm:$0xff] %v3334_v51 }
  0xea   :  { %v248_v50 = vpop.f32.mrb[6].mxu0 }
  0xeb   :  { %v3337_v52 = vadd.f32 %v3322_v42, %v248_v50  ;;  %v2575_v53 = vpop.f32.mrb[7].mxu0 }
  0xed   :  { %v2885_v54 = vpack.c.bf16 %v3337_v52, %v3334_v51 }
  0xee   :  { %v253_v55 = vpop.f32.mrb[8].mxu0 }
  0xef   :  { %v2578_v56 = vpop.f32.mrb[9].mxu0  ;;  %2886 = vmatpush1.bf16.msra.mxu1 %v2885_v54  ;;  %v3343_v58 = vadd.f32 %v3322_v42, %v253_v55 }
  0xf0   :  { %2887 = vmatprep.subr.bf16.mxu1 %v3055_v3 }
  0xf2   :  { %v258_v57 = vpop.f32.mrb[10].mxu0 }
  0xf3   :  { %v3346_v59 = vadd.f32 %v3322_v42, %v258_v57  ;;  %v2581_v60 = vpop.f32.mrb[11].mxu0 }
  0xf5   :  { %v2888_v61 = vpack.c.bf16 %v3346_v59, %v3343_v58 }
  0xf6   :  { %v263_v62 = vpop.f32.mrb[12].mxu0 }
  0xf7   :  { %v2584_v63 = vpop.f32.mrb[13].mxu0  ;;  %2889 = vmatpush1.bf16.msra.mxu1 %v2888_v61  ;;  %v3352_v1 = vadd.f32 %v3322_v42, %v263_v62 }
  0xf8   :  { %2890 = vmatprep.subr.bf16.mxu1 %v3055_v3 }
  0xfa   :  { %v268_v0 = vpop.f32.mrb[14].mxu0 }
  0xfb   :  { %v3355_v2 = vadd.f32 %v3322_v42, %v268_v0  ;;  %v2587_v4 = vpop.f32.mrb[15].mxu0 }
  0xfd   :  { %v2891_v5 = vpack.c.bf16 %v3355_v2, %v3352_v1 }
  0xfe   :  { %v273_v7 = vpop.f32.mrb[16].mxu0 }
  0xff   :  { %v2590_v8 = vpop.f32.mrb[17].mxu0  ;;  %2892 = vmatpush1.bf16.msra.mxu1 %v2891_v5  ;;  %v3361_v10 = vadd.f32 %v3322_v42, %v273_v7 }
 0x100   :  { %2893 = vmatprep.subr.bf16.mxu1 %v3055_v3 }
 0x102   :  { %v278_v9 = vpop.f32.mrb[18].mxu0 }
 0x103   :  { %v3364_v11 = vadd.f32 %v3322_v42, %v278_v9  ;;  %v2593_v12 = vpop.f32.mrb[19].mxu0 }
 0x105   :  { %v2894_v13 = vpack.c.bf16 %v3364_v11, %v3361_v10 }
 0x106   :  { %v283_v14 = vpop.f32.mrb[20].mxu0 }
 0x107   :  { %v2596_v15 = vpop.f32.mrb[21].mxu0  ;;  %2895 = vmatpush1.bf16.msra.mxu1 %v2894_v13  ;;  %v3370_v17 = vadd.f32 %v3322_v42, %v283_v14 }
 0x108   :  { %2896 = vmatprep.subr.bf16.mxu1 %v3055_v3 }
 0x10a   :  { %v288_v16 = vpop.f32.mrb[22].mxu0 }
 0x10b   :  { %v3373_v18 = vadd.f32 %v3322_v42, %v288_v16  ;;  %v2599_v19 = vpop.f32.mrb[23].mxu0 }
 0x10d   :  { %v2897_v20 = vpack.c.bf16 %v3373_v18, %v3370_v17 }
 0x10e   :  { %v293_v21 = vpop.f32.mrb[24].mxu0 }
 0x10f   :  { %v2602_v22 = vpop.f32.mrb[25].mxu0  ;;  %2898 = vmatpush1.bf16.msra.mxu1 %v2897_v20  ;;  %v3379_v24 = vadd.f32 %v3322_v42, %v293_v21 }
 0x110   :  { %2899 = vmatprep.subr.bf16.mxu1 %v3055_v3 }
 0x112   :  { %v298_v23 = vpop.f32.mrb[26].mxu0 }
 0x113   :  { %v3382_v25 = vadd.f32 %v3322_v42, %v298_v23  ;;  %v2605_v26 = vpop.f32.mrb[27].mxu0 }
 0x115   :  { %v2900_v27 = vpack.c.bf16 %v3382_v25, %v3379_v24 }
 0x116   :  { %v303_v28 = vpop.f32.mrb[28].mxu0 }
 0x117   :  { %v2608_v29 = vpop.f32.mrb[29].mxu0  ;;  %2901 = vmatpush1.bf16.msra.mxu1 %v2900_v27  ;;  %v3388_v31 = vadd.f32 %v3322_v42, %v303_v28 }
 0x118   :  { %2902 = vmatprep.subr.bf16.mxu1 %v3055_v3 }
 0x11a   :  { %v308_v30 = vpop.f32.mrb[30].mxu0 }
 0x11b   :  { %v3391_v32 = vadd.f32 %v3322_v42, %v308_v30  ;;  %v2611_v33 = vpop.f32.mrb[31].mxu0 }
 0x11d   :  { %v2903_v34 = vpack.c.bf16 %v3391_v32, %v3388_v31 }
 0x11e   :  { %v313_v35 = vpop.f32.mrb[32].mxu0 }
 0x11f   :  { %v2614_v36 = vpop.f32.mrb[33].mxu0  ;;  %2904 = vmatpush1.bf16.msra.mxu1 %v2903_v34  ;;  %v3397_v38 = vadd.f32 %v3322_v42, %v313_v35 }
 0x120   :  { %2905 = vmatprep.subr.bf16.mxu1 %v3055_v3 }
 0x122   :  { %v318_v37 = vpop.f32.mrb[34].mxu0 }
 0x123   :  { %v3400_v40 = vadd.f32 %v3322_v42, %v318_v37  ;;  %v2617_v41 = vpop.f32.mrb[35].mxu0 }
 0x125   :  { %v2906_v43 = vpack.c.bf16 %v3400_v40, %v3397_v38 }
 0x126   :  { %v323_v46 = vpop.f32.mrb[36].mxu0 }
 0x127   :  { %v2620_v47 = vpop.f32.mrb[37].mxu0  ;;  %2907 = vmatpush1.bf16.msra.mxu1 %v2906_v43  ;;  %v3406_v49 = vadd.f32 %v3322_v42, %v323_v46 }
 0x128   :  { %2908 = vmatprep.subr.bf16.mxu1 %v3055_v3  ;;  %v538_v47 = vmul.f32 %v3328_v45, %v3328_v45 }
 0x12a   :  { %v328_v48 = vpop.f32.mrb[38].mxu0 }
 0x12b   :  { %v3409_v50 = vadd.f32 %v3322_v42, %v328_v48  ;;  %v2623_v53 = vpop.f32.mrb[39].mxu0 }
 0x12d   :  { %v2909_v54 = vpack.c.bf16 %v3409_v50, %v3406_v49 }
 0x12e   :  { %v333_v55 = vpop.f32.mrb[40].mxu0 }
 0x12f   :  { %v2626_v56 = vpop.f32.mrb[41].mxu0  ;;  %2910 = vmatpush1.bf16.msra.mxu1 %v2909_v54  ;;  %v3415_v60 = vadd.f32 %v3322_v42, %v333_v55  ;;  %v537_v54 = vmul.f32 %v3325_v44, %v3325_v44  ;;  %v3469_v55 = vld [vmem:[%s4403_s4] sm:$0xff] }
 0x130   :  { %2911 = vmatprep.subr.bf16.mxu1 %v3055_v3  ;;  %v3474_v56 = vld [vmem:[%s4403_s4 + $0x18] sm:$0xff] }
 0x132   :  { %v338_v57 = vpop.f32.mrb[42].mxu0 }
 0x133   :  { %v3418_v61 = vadd.f32 %v3322_v42, %v338_v57  ;;  %v2629_v62 = vpop.f32.mrb[43].mxu0  ;;  %v540_v57 = vmul.f32 %v3337_v52, %v3337_v52 }
 0x134   :  { %v539_v62 = vmul.f32 %v3334_v51, %v3334_v51 }
 0x135   :  { %v2912_v63 = vpack.c.bf16 %v3418_v61, %v3415_v60 }
 0x136   :  { %v343_v0 = vpop.f32.mrb[44].mxu0 }
 0x137   :  { %v2632_v4 = vpop.f32.mrb[45].mxu0  ;;  %2913 = vmatpush1.bf16.msra.mxu1 %v2912_v63  ;;  %v3424_v7 = vadd.f32 %v3322_v42, %v343_v0  ;;  %v3489_v63 = vld [vmem:[%s4403_s4 + $0x10] sm:$0xff]  ;;  %v3495_v0 = vld [vmem:[%s4403_s4 + $0x28] sm:$0xff] }
 0x138   :  { %2914 = vmatprep.subr.bf16.mxu1 %v3055_v3  ;;  %v2930_v4 = vpack.c.bf16 %v540_v57, %v539_v62  ;;  %v3585_v57 = vld [vmem:[%s4403_s4 + $0x78] sm:$0x1f] }
 0x13a   :  { %v348_v5 = vpop.f32.mrb[46].mxu0 }
 0x13b   :  { %v3427_v8 = vadd.f32 %v3322_v42, %v348_v5  ;;  %v2635_v9 = vpop.f32.mrb[47].mxu0  ;;  %v542_v5 = vmul.f32 %v3346_v59, %v3346_v59 }
 0x13c   :  { %v541_v9 = vmul.f32 %v3343_v58, %v3343_v58 }
 0x13d   :  { %v2915_v12 = vpack.c.bf16 %v3427_v8, %v3424_v7 }
 0x13e   :  { %v353_v13 = vpop.f32.mrb[48].mxu0 }
 0x13f   :  { %v2638_v14 = vpop.f32.mrb[49].mxu0  ;;  %2916 = vmatpush1.bf16.msra.mxu1 %v2915_v12  ;;  %v3433_v16 = vadd.f32 %v3322_v42, %v353_v13  ;;  %v3507_v12 = vld [vmem:[%s4403_s4 + $0x20] sm:$0xff]  ;;  %v3513_v13 = vld [vmem:[%s4403_s4 + $0x38] sm:$0xff] }
 0x140   :  { %2917 = vmatprep.subr.bf16.mxu1 %v3055_v3  ;;  %v2933_v14 = vpack.c.bf16 %v542_v5, %v541_v9  ;;  %v551_v5 = vmul.f32 %v3388_v31, %v3388_v31  ;;  %v401_v9 = vld [vmem:[%s4403_s4 + $0x70] sm:$0x1f] }
 0x142   :  { %v358_v15 = vpop.f32.mrb[50].mxu0 }
 0x143   :  { %v3436_v19 = vadd.f32 %v3322_v42, %v358_v15  ;;  %v2641_v20 = vpop.f32.mrb[51].mxu0  ;;  %v544_v15 = vmul.f32 %v3355_v2, %v3355_v2 }
 0x144   :  { %v543_v20 = vmul.f32 %v3352_v1, %v3352_v1 }
 0x145   :  { %v2918_v21 = vpack.c.bf16 %v3436_v19, %v3433_v16 }
 0x146   :  { %v363_v22 = vpop.f32.mrb[52].mxu0 }
 0x147   :  { %v2644_v23 = vpop.f32.mrb[53].mxu0  ;;  %2919 = vmatpush1.bf16.msra.mxu1 %v2918_v21  ;;  %v3442_v27 = vadd.f32 %v3322_v42, %v363_v22  ;;  %v3525_v21 = vld [vmem:[%s4403_s4 + $0x30] sm:$0xff]  ;;  %v3531_v22 = vld [vmem:[%s4403_s4 + $0x48] sm:$0xff] }
 0x148   :  { %2920 = vmatprep.subr.bf16.mxu1 %v3055_v3  ;;  %v2936_v23 = vpack.c.bf16 %v544_v15, %v543_v20  ;;  %v554_v15 = vmul.f32 %v3400_v40, %v3400_v40  ;;  %v553_v20 = vmul.f32 %v3397_v38, %v3397_v38 }
 0x149   :  { %4419 = vst [vmem:[#allocation9_spill] sm:$0xff] %v3442_v27 }
 0x14a   :  { %v368_v26 = vpop.f32.mrb[54].mxu0 }
 0x14b   :  { %v3445_v28 = vadd.f32 %v3322_v42, %v368_v26  ;;  %v2647_v29 = vpop.f32.mrb[55].mxu0  ;;  %v546_v26 = vmul.f32 %v3364_v11, %v3364_v11 }
 0x14c   :  { %v545_v29 = vmul.f32 %v3361_v10, %v3361_v10 }
 0x14d   :  { %4420 = vst [vmem:[#allocation10_spill] sm:$0xff] %v3445_v28  ;;  %v2921_v30 = vpack.c.bf16 %v3445_v28, %v3442_v27 }
 0x14e   :  { %v373_v33 = vpop.f32.mrb[56].mxu0 }
 0x14f   :  { %v2650_v34 = vpop.f32.mrb[57].mxu0  ;;  %2922 = vmatpush1.bf16.msra.mxu1 %v2921_v30  ;;  %v3451_v36 = vadd.f32 %v3322_v42, %v373_v33  ;;  %v3543_v30 = vld [vmem:[%s4403_s4 + $0x40] sm:$0xff]  ;;  %v3549_v33 = vld [vmem:[%s4403_s4 + $0x58] sm:$0xff] }
 0x150   :  { %2923 = vmatprep.subr.bf16.mxu1 %v3055_v3  ;;  %v2939_v34 = vpack.c.bf16 %v546_v26, %v545_v29  ;;  %v556_v26 = vmul.f32 %v3409_v50, %v3409_v50  ;;  %v555_v29 = vmul.f32 %v3406_v49, %v3406_v49 }
 0x151   :  { %4421 = vst [vmem:[#allocation11_spill] sm:$0xff] %v3451_v36 }
 0x152   :  { %v378_v35 = vpop.f32.mrb[58].mxu0 }
 0x153   :  { %v3454_v37 = vadd.f32 %v3322_v42, %v378_v35  ;;  %v2653_v41 = vpop.f32.mrb[59].mxu0  ;;  %v548_v35 = vmul.f32 %v3373_v18, %v3373_v18 }
 0x154   :  { %v547_v41 = vmul.f32 %v3370_v17, %v3370_v17 }
 0x155   :  { %4422 = vst [vmem:[#allocation12_spill] sm:$0xff] %v3454_v37  ;;  %v2924_v43 = vpack.c.bf16 %v3454_v37, %v3451_v36 }
 0x156   :  { %v383_v46 = vpop.f32.mrb[60].mxu0 }
 0x157   :  { %v3461_v48 = vadd.f32 %v3322_v42, %v383_v46  ;;  %2925 = vmatpush1.bf16.msra.mxu1 %v2924_v43  ;;  %v2656_v53 = vpop.f32.mrb[61].mxu0  ;;  %v2927_v42 = vpack.c.bf16 %v538_v47, %v537_v54  ;;  %v3561_v43 = vld [vmem:[%s4403_s4 + $0x50] sm:$0xff]  ;;  %v3567_v46 = vld [vmem:[%s4403_s4 + $0x68] sm:$0xff]  ;;  %v2942_v47 = vpack.c.bf16 %v548_v35, %v547_v41  ;;  %v549_v54 = vmul.f32 %v3379_v24, %v3379_v24 }
 0x158   :  { %492 = vmatprep.subr.mxu1 %v3057_v6  ;;  %v550_v53 = vmul.f32 %v3382_v25, %v3382_v25  ;;  %v558_v35 = vmul.f32 %v3418_v61, %v3418_v61  ;;  %v557_v41 = vmul.f32 %v3415_v60, %v3415_v60 }
 0x159   :  { %4423 = vst [vmem:[#allocation13_spill] sm:$0xff] %v3461_v48 }
 0x15a   :  { %v2945_v62 = vpack.c.bf16 %v550_v53, %v549_v54  ;;  %v559_v53 = vmul.f32 %v3424_v7, %v3424_v7 }
 0x15b   :  { %2361 = vmatpush1.msk.msra.mxu1 %vm428_vm3, %v3461_v48 }
 0x15c   :  { %497 = vmatmul.mubr.f32.vlgmr.msra.gmra.mrb[0].mxu1 %v3469_v55  ;;  %2926 = vmatprep.subr.bf16.mxu1 %v3055_v3 }
 0x15d   :  { %2928 = vmatpush1.bf16.msra.mxu1 %v2927_v42  ;;  %2363 = vmatprep.mubr.msk.f32.mxu1 %vm403_vm2, %v3474_v56  ;;  %v3579_v42 = vld [vmem:[%s4403_s4 + $0x60] sm:$0xff] }
 0x15e   :  { %2929 = vmatprep.subr.bf16.mxu1 %v3055_v3 }
 0x160   :  { %502 = vmatmul.mubr.f32.gmra.mrb[2].mxu1 %v3489_v63 }
 0x161   :  { %2931 = vmatpush1.bf16.msra.mxu1 %v2930_v4  ;;  %2364 = vmatprep.mubr.msk.f32.mxu1 %vm403_vm2, %v3495_v0  ;;  %v552_v4 = vmul.f32 %v3391_v32, %v3391_v32 }
 0x162   :  { %2932 = vmatprep.subr.bf16.mxu1 %v3055_v3 }
 0x164   :  { %507 = vmatmul.mubr.f32.gmra.mrb[4].mxu1 %v3507_v12 }
 0x165   :  { %2934 = vmatpush1.bf16.msra.mxu1 %v2933_v14  ;;  %2365 = vmatprep.mubr.msk.f32.mxu1 %vm403_vm2, %v3513_v13  ;;  %v2948_v14 = vpack.c.bf16 %v552_v4, %v551_v5  ;;  %v561_v4 = vmul.f32 %v3433_v16, %v3433_v16 }
 0x166   :  { %2935 = vmatprep.subr.bf16.mxu1 %v3055_v3 }
 0x168   :  { %512 = vmatmul.mubr.f32.gmra.mrb[6].mxu1 %v3525_v21 }
 0x169   :  { %2937 = vmatpush1.bf16.msra.mxu1 %v2936_v23  ;;  %2366 = vmatprep.mubr.msk.f32.mxu1 %vm403_vm2, %v3531_v22  ;;  %v2951_v23 = vpack.c.bf16 %v554_v15, %v553_v20  ;;  %v563_v15 = vmul.f32 %v3442_v27, %v3442_v27 }
 0x16a   :  { %2938 = vmatprep.subr.bf16.mxu1 %v3055_v3 }
 0x16c   :  { %517 = vmatmul.mubr.f32.gmra.mrb[8].mxu1 %v3543_v30 }
 0x16d   :  { %2940 = vmatpush1.bf16.msra.mxu1 %v2939_v34  ;;  %2367 = vmatprep.mubr.msk.f32.mxu1 %vm403_vm2, %v3549_v33  ;;  %v2954_v34 = vpack.c.bf16 %v556_v26, %v555_v29  ;;  %v565_v26 = vmul.f32 %v3451_v36, %v3451_v36 }
 0x16e   :  { %2941 = vmatprep.subr.bf16.mxu1 %v3055_v3 }
 0x170   :  { %522 = vmatmul.mubr.f32.gmra.mrb[10].mxu1 %v3561_v43 }
 0x171   :  { %2943 = vmatpush1.bf16.msra.mxu1 %v2942_v47  ;;  %2368 = vmatprep.mubr.msk.f32.mxu1 %vm403_vm2, %v3567_v46  ;;  %v560_v47 = vmul.f32 %v3427_v8, %v3427_v8 }
 0x172   :  { %2944 = vmatprep.subr.bf16.mxu1 %v3055_v3 }
 0x173   :  { %v2960_v54 = vpack.c.bf16 %v560_v47, %v559_v53 }
 0x174   :  { %527 = vmatmul.mubr.f32.gmra.mrb[12].mxu1 %v3579_v42 }
 0x175   :  { %2946 = vmatpush1.bf16.msra.mxu1 %v2945_v62  ;;  %2369 = vmatprep.mubr.msk.f32.mxu1 %vm403_vm2, %v3585_v57  ;;  %v562_v62 = vmul.f32 %v3436_v19, %v3436_v19 }
 0x176   :  { %2947 = vmatprep.subr.bf16.mxu1 %v3055_v3 }
 0x177   :  { %v2963_v5 = vpack.c.bf16 %v562_v62, %v561_v4 }
 0x178   :  { %532 = vmatmul.mubr.f32.gmra.mrb[14].mxu1 %v401_v9 }
 0x179   :  { %2949 = vmatpush1.bf16.msra.mxu1 %v2948_v14  ;;  %2371 = vmatprep.mubr.msk.f32.mxu1 %vm403_vm2, %v3315_v39  ;;  %v2957_v39 = vpack.c.bf16 %v558_v35, %v557_v41  ;;  %v564_v14 = vmul.f32 %v3445_v28, %v3445_v28 }
 0x17a   :  { %2950 = vmatprep.subr.bf16.mxu1 %v3055_v3 }
 0x17b   :  { %v2966_v20 = vpack.c.bf16 %v564_v14, %v563_v15 }
 0x17d   :  { %2952 = vmatpush1.bf16.msra.mxu1 %v2951_v23  ;;  %v566_v23 = vmul.f32 %v3454_v37, %v3454_v37 }
 0x17e   :  { %2953 = vmatprep.subr.bf16.mxu1 %v3055_v3 }
 0x17f   :  { %v2969_v29 = vpack.c.bf16 %v566_v23, %v565_v26 }
 0x181   :  { %2955 = vmatpush1.bf16.msra.mxu1 %v2954_v34  ;;  %v567_v34 = vmul.f32 %v3461_v48, %v3461_v48 }
 0x182   :  { %2956 = vmatprep.subr.bf16.mxu1 %v3055_v3 }
 0x185   :  { %2958 = vmatpush1.bf16.msra.mxu1 %v2957_v39 }
 0x186   :  { %2959 = vmatprep.subr.bf16.mxu1 %v3055_v3 }
 0x189   :  { %2961 = vmatpush1.bf16.msra.mxu1 %v2960_v54 }
 0x18a   :  { %2962 = vmatprep.subr.bf16.mxu1 %v3055_v3 }
 0x18d   :  { %2964 = vmatpush1.bf16.msra.mxu1 %v2963_v5 }
 0x18e   :  { %2965 = vmatprep.subr.bf16.mxu1 %v3055_v3 }
 0x191   :  { %2967 = vmatpush1.bf16.msra.mxu1 %v2966_v20 }
 0x192   :  { %2968 = vmatprep.subr.bf16.mxu1 %v3055_v3 }
 0x195   :  { %2970 = vmatpush1.bf16.msra.mxu1 %v2969_v29 }
 0x196   :  { %631 = vmatprep.subr.mxu1 %v3057_v6 }
 0x199   :  { %2370 = vmatpush1.msk.msra.mxu1 %vm428_vm3, %v567_v34 }
 0x19a   :  { %636 = vmatmul.mubr.f32.vlgmr.msra.gmra.mrb[16].mxu1 %v3469_v55  ;;  %2997 = vmatprep.subr.bf16.mxu1 %v3055_v3 }
 0x19b   :  { %2372 = vmatprep.mubr.msk.f32.mxu1 %vm403_vm2, %v3474_v56 }
 0x19e   :  { %641 = vmatmul.mubr.f32.gmra.mrb[18].mxu1 %v3489_v63 }
 0x19f   :  { %2373 = vmatprep.mubr.msk.f32.mxu1 %vm403_vm2, %v3495_v0 }
 0x1a2   :  { %646 = vmatmul.mubr.f32.gmra.mrb[20].mxu1 %v3507_v12 }
 0x1a3   :  { %2374 = vmatprep.mubr.msk.f32.mxu1 %vm403_vm2, %v3513_v13 }
 0x1a6   :  { %651 = vmatmul.mubr.f32.gmra.mrb[22].mxu1 %v3525_v21 }
 0x1a7   :  { %2375 = vmatprep.mubr.msk.f32.mxu1 %vm403_vm2, %v3531_v22 }
 0x1aa   :  { %656 = vmatmul.mubr.f32.gmra.mrb[24].mxu1 %v3543_v30 }
 0x1ab   :  { %2376 = vmatprep.mubr.msk.f32.mxu1 %vm403_vm2, %v3549_v33 }
 0x1ae   :  { %661 = vmatmul.mubr.f32.gmra.mrb[26].mxu1 %v3561_v43 }
 0x1af   :  { %2377 = vmatprep.mubr.msk.f32.mxu1 %vm403_vm2, %v3567_v46 }
 0x1b2   :  { %666 = vmatmul.mubr.f32.gmra.mrb[28].mxu1 %v3579_v42 }
 0x1b3   :  { %2378 = vmatprep.mubr.msk.f32.mxu1 %vm403_vm2, %v3585_v57 }
 0x1b6   :  { %671 = vmatmul.mubr.f32.gmra.mrb[30].mxu1 %v401_v9 }
 0x1b7   :  { %2791 = vmatprep.mubr.msk.f32.mxu1 %vm3056_vm0, %v3057_v6 }
 0x22f   :  { %v498_v55 = vpop.f32.mrb[0].mxu1 }
 0x230   :  { %v500_v56 = vpop.f32.mrb[1].mxu1  ;;  %676 = vadd.xlane.f32.xlu0 %v498_v55 }
 0x233   :  { %v503_v63 = vpop.f32.mrb[2].mxu1 }
 0x234   :  { %v505_v0 = vpop.f32.mrb[3].mxu1  ;;  %678 = vadd.xlane.f32.xlu0 %v503_v63 }
 0x237   :  { %v508_v12 = vpop.f32.mrb[4].mxu1 }
 0x238   :  { %v510_v13 = vpop.f32.mrb[5].mxu1  ;;  %680 = vadd.xlane.f32.xlu0 %v508_v12 }
 0x23b   :  { %v513_v21 = vpop.f32.mrb[6].mxu1 }
 0x23c   :  { %v515_v22 = vpop.f32.mrb[7].mxu1  ;;  %682 = vadd.xlane.f32.xlu1 %v513_v21 }
 0x23f   :  { %v518_v30 = vpop.f32.mrb[8].mxu1 }
 0x240   :  { %v520_v33 = vpop.f32.mrb[9].mxu1  ;;  %684 = vadd.xlane.f32.xlu0 %v518_v30 }
 0x243   :  { %v523_v43 = vpop.f32.mrb[10].mxu1 }
 0x244   :  { %v525_v46 = vpop.f32.mrb[11].mxu1  ;;  %686 = vadd.xlane.f32.xlu1 %v523_v43 }
 0x247   :  { %v528_v42 = vpop.f32.mrb[12].mxu1 }
 0x248   :  { %v530_v57 = vpop.f32.mrb[13].mxu1  ;;  %688 = vadd.xlane.f32.xlu0 %v528_v42 }
 0x24b   :  { %v533_v9 = vpop.f32.mrb[14].mxu1 }
 0x24c   :  { %v535_v35 = vpop.f32.mrb[15].mxu1  ;;  %v691_v41 = vsel %vm690_vm4, %v533_v9, 0.0 }
 0x24d   :  { %692 = vadd.xlane.f32.xlu1 %v691_v41 }
 0x26d   :  { %v637_v39 = vpop.f32.mrb[16].mxu1 }
 0x26e   :  { %702 = vadd.xlane.f32.xlu1 %v637_v39  ;;  %v639_v47 = vpop.f32.mrb[17].mxu1 }
 0x271   :  { %v642_v53 = vpop.f32.mrb[18].mxu1 }
 0x272   :  { %704 = vadd.xlane.f32.xlu1 %v642_v53  ;;  %v644_v54 = vpop.f32.mrb[19].mxu1 }
 0x275   :  { %v647_v62 = vpop.f32.mrb[20].mxu1 }
 0x276   :  { %706 = vadd.xlane.f32.xlu0 %v647_v62  ;;  %v649_v4 = vpop.f32.mrb[21].mxu1 }
 0x279   :  { %v652_v5 = vpop.f32.mrb[22].mxu1 }
 0x27a   :  { %708 = vadd.xlane.f32.xlu1 %v652_v5  ;;  %v654_v14 = vpop.f32.mrb[23].mxu1 }
 0x27d   :  { %v657_v15 = vpop.f32.mrb[24].mxu1 }
 0x27e   :  { %710 = vadd.xlane.f32.xlu0 %v657_v15  ;;  %v659_v20 = vpop.f32.mrb[25].mxu1 }
 0x281   :  { %v662_v23 = vpop.f32.mrb[26].mxu1 }
 0x282   :  { %712 = vadd.xlane.f32.xlu1 %v662_v23  ;;  %v664_v26 = vpop.f32.mrb[27].mxu1 }
 0x285   :  { %v667_v29 = vpop.f32.mrb[28].mxu1 }
 0x286   :  { %714 = vadd.xlane.f32.xlu0 %v667_v29  ;;  %v669_v34 = vpop.f32.mrb[29].mxu1 }
 0x289   :  { %v672_v55 = vpop.f32.mrb[30].mxu1 }
 0x28a   :  { %v716_v56 = vsel %vm690_vm4, %v672_v55, 0.0  ;;  %v674_v63 = vpop.f32.mrb[31].mxu1 }
 0x28b   :  { %717 = vadd.xlane.f32.xlu1 %v716_v56 }
 0x2bd   :  { %v677_v0 = vpop.xlane.xlu0 %676 }
 0x2be   :  { %v694_v33 = vmul.f32 0.00390625, %v677_v0 }
 0x2c0   :  { %v727_v42 = vmul.f32 %v694_v33, %v694_v33 }
 0x2c1   :  { %v679_v13 = vpop.xlane.xlu0 %678 }
 0x2c2   :  { %v695_v57 = vmul.f32 0.00390625, %v679_v13 }
 0x2c4   :  { %v728_v47 = vmul.f32 %v695_v57, %v695_v57 }
 0x2c5   :  { %v681_v30 = vpop.xlane.xlu0 %680 }
 0x2c6   :  { %v3667_v53 = vmul.f32 0.00390625, %v681_v30 }
 0x2c8   :  { %v729_v20 = vmul.f32 %v3667_v53, %v3667_v53 }
 0x2c9   :  { %v683_v12 = vpop.xlane.xlu1 %682 }
 0x2ca   :  { %v3669_v14 = vmul.f32 0.00390625, %v683_v12 }
 0x2cc   :  { %v730_v55 = vmul.f32 %v3669_v14, %v3669_v14 }
 0x2cd   :  { %v685_v43 = vpop.xlane.xlu0 %684 }
 0x2ce   :  { %v3675_v63 = vmul.f32 0.00390625, %v685_v43 }
 0x2d1   :  { %v687_v21 = vpop.xlane.xlu1 %686 }
 0x2d5   :  { %v689_v41 = vpop.xlane.xlu0 %688 }
 0x2da   :  { %v3665_v22 = vpop.xlane.xlu1 %692 }
 0x2fb   :  { %v703_v46 = vpop.xlane.xlu1 %702 }
 0x2fc   :  { %v719_v9 = vmul.f32 0.00390625, %v703_v46  ;;  %v3677_v46 = vmul.f32 0.00390625, %v687_v21 }
 0x2fe   :  { %v735_v35 = vsub.f32 %v719_v9, %v727_v42  ;;  %v731_v9 = vmul.f32 %v3675_v63, %v3675_v63 }
 0x2ff   :  { %v705_v39 = vpop.xlane.xlu1 %704 }
 0x300   :  { %v743_v54 = vmax.f32 %v735_v35, 0.0  ;;  %v720_v62 = vmul.f32 0.00390625, %v705_v39 }
 0x302   :  { %v759_v4 = vadd.f32 1e-05, %v743_v54  ;;  %v736_v5 = vsub.f32 %v720_v62, %v728_v47  ;;  %v751_v47 = vld [vmem:[%s4405_s6] sm:$0xff] }
 0x303   :  { %v707_v15 = vpop.xlane.xlu0 %706 }
 0x304   :  { %3015 = vrsqrt.f32 %v759_v4  ;;  %v744_v23 = vmax.f32 %v736_v5, 0.0  ;;  %v721_v26 = vmul.f32 0.00390625, %v707_v15  ;;  %v732_v4 = vmul.f32 %v3677_v46, %v3677_v46 }
 0x305   :  { %v3686_v15 = vmul.f32 0.00390625, %v689_v41 }
 0x306   :  { %v760_v29 = vadd.f32 1e-05, %v744_v23  ;;  %v737_v34 = vsub.f32 %v721_v26, %v729_v20  ;;  %v752_v26 = vld [vmem:[%s4405_s6 + $0x8] sm:$0xff] }
 0x307   :  { %v709_v56 = vpop.xlane.xlu1 %708 }
 0x308   :  { %3017 = vrsqrt.f32 %v760_v29  ;;  %v745_v0 = vmax.f32 %v737_v34, 0.0  ;;  %v722_v13 = vmul.f32 0.00390625, %v709_v56 }
 0x30a   :  { %v761_v12 = vadd.f32 1e-05, %v745_v0  ;;  %v738_v30 = vsub.f32 %v722_v13, %v730_v55 }
 0x30b   :  { %v711_v42 = vpop.xlane.xlu0 %710 }
 0x30c   :  { %3019 = vrsqrt.f32 %v761_v12  ;;  %v746_v35 = vmax.f32 %v738_v30, 0.0  ;;  %v723_v39 = vmul.f32 0.00390625, %v711_v42  ;;  %v733_v12 = vmul.f32 %v3686_v15, %v3686_v15  ;;  %v783_v42 = vld [vmem:[%s4406_s7] sm:$0xff] }
 0x30e   :  { %v3016_v43 = vpop.eup %3015  ;;  %v762_v54 = vadd.f32 1e-05, %v746_v35  ;;  %v739_v62 = vsub.f32 %v723_v39, %v731_v9  ;;  %v784_v9 = vld [vmem:[%s4406_s7 + $0x8] sm:$0xff]  ;;  %v753_v35 = vld [vmem:[%s4405_s6 + $0x10] sm:$0xff] }
 0x30f   :  { %v713_v5 = vpop.xlane.xlu1 %712  ;;  %v775_v21 = vmul.f32 %v3016_v43, %v751_v47 }
 0x310   :  { %3021 = vrsqrt.f32 %v762_v54  ;;  %v747_v20 = vmax.f32 %v739_v62, 0.0  ;;  %v724_v23 = vmul.f32 0.00390625, %v713_v5 }
 0x311   :  { %v791_v13 = vmul.f32 %v775_v21, %v694_v33  ;;  %v3703_v33 = vmul.f32 0.00390625, %v3665_v22 }
 0x312   :  { %v3018_v29 = vpop.eup %3017  ;;  %v763_v34 = vadd.f32 1e-05, %v747_v20  ;;  %v740_v55 = vsub.f32 %v724_v23, %v732_v4 }
 0x313   :  { %v715_v56 = vpop.xlane.xlu0 %714  ;;  %v776_v0 = vmul.f32 %v3018_v29, %v752_v26  ;;  %v799_v4 = vsub.f32 %v783_v42, %v791_v13  ;;  %v754_v29 = vld [vmem:[%s4405_s6 + $0x18] sm:$0xff]  ;;  %v734_v22 = vmul.f32 %v3703_v33, %v3703_v33 }
 0x314   :  { %3023 = vrsqrt.f32 %v763_v34  ;;  %v748_v30 = vmax.f32 %v740_v55, 0.0  ;;  %v725_v41 = vmul.f32 0.00390625, %v715_v56 }
 0x315   :  { %v2972_v39 = vpack.c.bf16 %v776_v0, %v775_v21  ;;  %v792_v47 = vmul.f32 %v776_v0, %v695_v57 }
 0x316   :  { %v3020_v43 = vpop.eup %3019  ;;  %v764_v54 = vadd.f32 1e-05, %v748_v30  ;;  %v741_v62 = vsub.f32 %v725_v41, %v733_v12  ;;  %v785_v12 = vld [vmem:[%s4406_s7 + $0x10] sm:$0xff]  ;;  %v786_v30 = vld [vmem:[%s4406_s7 + $0x18] sm:$0xff]  ;;  %v755_v41 = vld [vmem:[%s4405_s6 + $0x20] sm:$0xff] }
 0x317   :  { %2973 = vmatpush3.bf16.msra.mxu0 %v2972_v39  ;;  %v800_v5 = vsub.f32 %v784_v9, %v792_v47  ;;  %v777_v20 = vmul.f32 %v3020_v43, %v753_v35 }
 0x318   :  { %3025 = vrsqrt.f32 %v764_v54  ;;  %v749_v23 = vmax.f32 %v741_v62, 0.0  ;;  %v718_v26 = vpop.xlane.xlu1 %717  ;;  %2974 = vmatprep.subr.bf16.mxu0 %v3055_v3  ;;  %v756_v62 = vld [vmem:[%s4405_s6 + $0x28] sm:$0xff] }
 0x319   :  { %v726_v57 = vmul.f32 0.00390625, %v718_v26  ;;  %v2985_v21 = vpack.c.bf16 %v800_v5, %v799_v4  ;;  %v793_v13 = vmul.f32 %v777_v20, %v3667_v53  ;;  %v788_v26 = vld [vmem:[%s4406_s7 + $0x28] sm:$0xff] }
 0x31a   :  { %v3022_v34 = vpop.eup %3021  ;;  %v765_v55 = vadd.f32 1e-05, %v749_v23 }
 0x31b   :  { %v742_v56 = vsub.f32 %v726_v57, %v734_v22  ;;  %3001 = vmatpush3.bf16.msra.mxu1 %v2985_v21  ;;  %v778_v0 = vmul.f32 %v3022_v34, %v754_v29  ;;  %v801_v47 = vsub.f32 %v785_v12, %v793_v13  ;;  %v757_v57 = vld [vmem:[%s4405_s6 + $0x30] sm:$0xff]  ;;  %v758_v13 = vld [vmem:[%s4405_s6 + $0x38] sm:$0x1f] }
 0x31c   :  { %3027 = vrsqrt.f32 %v765_v55  ;;  %2998 = vmatprep.subr.bf16.mxu1 %v3055_v3 }
 0x31d   :  { %v750_v42 = vmax.f32 %v742_v56, 0.0  ;;  %v2975_v9 = vpack.c.bf16 %v778_v0, %v777_v20  ;;  %v794_v35 = vmul.f32 %v778_v0, %v3669_v14  ;;  %v787_v14 = vld [vmem:[%s4406_s7 + $0x20] sm:$0xff] }
 0x31e   :  { %v3024_v53 = vpop.eup %3023 }
 0x31f   :  { %v766_v39 = vadd.f32 1e-05, %v750_v42  ;;  %2976 = vmatpush3.bf16.msra.mxu0 %v2975_v9  ;;  %v802_v43 = vsub.f32 %v786_v30, %v794_v35  ;;  %v779_v54 = vmul.f32 %v3024_v53, %v755_v41  ;;  %v789_v42 = vld [vmem:[%s4406_s7 + $0x30] sm:$0xff]  ;;  %v790_v9 = vld [vmem:[%s4406_s7 + $0x38] sm:$0x1f] }
 0x320   :  { %2977 = vmatprep.subr.bf16.mxu0 %v3055_v3  ;;  %v830_v41 = vld [vmem:[%s4404_s5 + $0xb8] sm:$0xff] }
 0x321   :  { %3029 = vrsqrt.f32 %v766_v39  ;;  %v2988_v4 = vpack.c.bf16 %v802_v43, %v801_v47  ;;  %v795_v20 = vmul.f32 %v779_v54, %v3675_v63 }
 0x322   :  { %v3026_v5 = vpop.eup %3025 }
 0x323   :  { %3002 = vmatpush3.bf16.msra.mxu1 %v2988_v4  ;;  %v780_v23 = vmul.f32 %v3026_v5, %v756_v62  ;;  %v803_v63 = vsub.f32 %v787_v14, %v795_v20  ;;  %v811_v62 = vld [vmem:[%s4404_s5 + $0x20] sm:$0xff]  ;;  %v3059_v5 = vmov 0   ;;  %v816_v14 = vld [vmem:[%s4404_s5 + $0x48] sm:$0xff] }
 0x324   :  { %2999 = vmatprep.subr.bf16.mxu1 %v3055_v3  ;;  %3013 = vset.pattern.permute.xlu0 %v3059_v5  ;;  %v815_v20 = vld [vmem:[%s4404_s5 + $0x40] sm:$0xff] }
 0x325   :  { %v2978_v29 = vpack.c.bf16 %v780_v23, %v779_v54  ;;  %v796_v22 = vmul.f32 %v780_v23, %v3677_v46  ;;  %v810_v54 = vld [vmem:[%s4404_s5 + $0x18] sm:$0xff]  ;;  %3014 = vset.pattern.permute.xlu1 %v3059_v5  ;;  %v813_v23 = vld [vmem:[%s4404_s5 + $0x30] sm:$0xff] }
 0x326   :  { %v3028_v34 = vpop.eup %3027 }
 0x327   :  { %2979 = vmatpush3.bf16.msra.mxu0 %v2978_v29  ;;  %v804_v55 = vsub.f32 %v788_v26, %v796_v22  ;;  %v781_v56 = vmul.f32 %v3028_v34, %v757_v57  ;;  %v817_v26 = vld [vmem:[%s4404_s5 + $0x50] sm:$0xff]  ;;  %v818_v29 = vld [vmem:[%s4404_s5 + $0x58] sm:$0xff]  ;;  %v819_v22 = vld [vmem:[%s4404_s5 + $0x60] sm:$0xff] }
 0x328   :  { %2980 = vmatprep.subr.bf16.mxu0 %v3055_v3  ;;  %v820_v57 = vld [vmem:[%s4404_s5 + $0x68] sm:$0xff]  ;;  %v821_v34 = vld [vmem:[%s4404_s5 + $0x70] sm:$0xff] }
 0x329   :  { %v2991_v0 = vpack.c.bf16 %v804_v55, %v803_v63  ;;  %v797_v46 = vmul.f32 %v781_v56, %v3686_v15  ;;  %v3762_v15 = vld [vmem:[%s4404_s5] sm:$0xff]  ;;  %v822_v63 = vld [vmem:[%s4404_s5 + $0x78] sm:$0xff] }
 0x32a   :  { %v823_v55 = vld [vmem:[%s4404_s5 + $0x80] sm:$0xff] }
 0x32b   :  { %v3030_v12 = vpop.eup %3029  ;;  %3003 = vmatpush3.bf16.msra.mxu1 %v2991_v0  ;;  %v805_v39 = vsub.f32 %v789_v42, %v797_v46  ;;  %v829_v46 = vld [vmem:[%s4404_s5 + $0xb0] sm:$0xff]  ;;  %v831_v42 = vld [vmem:[%s4404_s5 + $0xc0] sm:$0xff] }
 0x32c   :  { %v782_v30 = vmul.f32 %v3030_v12, %v758_v13  ;;  %3000 = vmatprep.subr.bf16.mxu1 %v3055_v3  ;;  %v826_v13 = vld [vmem:[%s4404_s5 + $0x98] sm:$0xff]  ;;  %v827_v12 = vld [vmem:[%s4404_s5 + $0xa0] sm:$0xff] }
 0x32e   :  { %v2981_v35 = vpack.c.bf16 %v782_v30, %v781_v56  ;;  %v798_v53 = vmul.f32 %v782_v30, %v3703_v33  ;;  %v3772_v33 = vld [vmem:[%s4404_s5 + $0x8] sm:$0xff] }
 0x32f   :  { %v824_v56 = vld [vmem:[%s4404_s5 + $0x88] sm:$0xff] }
 0x330   :  { %2983 = vmatpush3.bf16.msk.msra.mxu0 %vm3746_vm6, %v2981_v35  ;;  %v806_v47 = vsub.f32 %v790_v9, %v798_v53  ;;  %v828_v30 = vld [vmem:[%s4404_s5 + $0xa8] sm:$0xff]  ;;  %v833_v35 = vld [vmem:[%s4404_s5 + $0xd0] sm:$0xff]  ;;  %v834_v53 = vld [vmem:[%s4404_s5 + $0xd8] sm:$0xff] }
 0x331   :  { %2984 = vmatprep.subr.bf16.mxu0 %v3055_v3  ;;  %v832_v9 = vld [vmem:[%s4404_s5 + $0xc8] sm:$0xff] }
 0x332   :  { %v2994_v43 = vpack.c.bf16 %v806_v47, %v805_v39  ;;  %v835_v39 = vld [vmem:[%s4404_s5 + $0xe0] sm:$0xff]  ;;  %v836_v47 = vld [vmem:[%s4404_s5 + $0xe8] sm:$0xff] }
 0x333   :  { %2674 = vmatmul.mubr.msk.f32.vlgmr.msra.gmra.mrb[62].mxu0 %vm838_vm7, %v3762_v15 }
 0x334   :  { %2986 = vmatpush3.bf16.msra.mxu0 %v2985_v21  ;;  %3004 = vmatpush3.bf16.msk.msra.mxu1 %vm3746_vm6, %v2994_v43  ;;  %v3788_v21 = vld [vmem:[%s4404_s5 + $0x10] sm:$0xff] }
 0x335   :  { %2676 = vmatprep.mubr.msk.f32.mxu0 %vm3056_vm0, %v3057_v6  ;;  %2987 = vmatprep.subr.bf16.mxu0 %v3055_v3 }
 0x337   :  { %2677 = vmatmul.mubr.msk.f32.gmra.mrb[64].mxu0 %vm838_vm7, %v3772_v33  ;;  %2792 = vmatmul.mubr.msk.f32.vlgmr.msra.gmra.mrb[32].mxu1 %vm838_vm7, %v810_v54 }
 0x338   :  { %2989 = vmatpush3.bf16.msra.mxu0 %v2988_v4  ;;  %2679 = vmatprep.mubr.msk.f32.mxu0 %vm3056_vm0, %v3057_v6  ;;  %v812_v4 = vld [vmem:[%s4404_s5 + $0x28] sm:$0xff] }
 0x339   :  { %2794 = vmatprep.mubr.msk.f32.mxu1 %vm3056_vm0, %v3057_v6  ;;  %2990 = vmatprep.subr.bf16.mxu0 %v3055_v3 }
 0x33b   :  { %2680 = vmatmul.mubr.msk.f32.gmra.mrb[66].mxu0 %vm838_vm7, %v3788_v21  ;;  %2795 = vmatmul.mubr.msk.f32.gmra.mrb[34].mxu1 %vm838_vm7, %v811_v62 }
 0x33c   :  { %2992 = vmatpush3.bf16.msra.mxu0 %v2991_v0  ;;  %2682 = vmatprep.mubr.msk.f32.mxu0 %vm3056_vm0, %v3057_v6  ;;  %v825_v0 = vld [vmem:[%s4404_s5 + $0x90] sm:$0xff] }
 0x33d   :  { %2797 = vmatprep.mubr.msk.f32.mxu1 %vm3056_vm0, %v3057_v6  ;;  %2993 = vmatprep.subr.bf16.mxu0 %v3055_v3  ;;  %v814_v3 = vld [vmem:[%s4404_s5 + $0x38] sm:$0xff] }
 0x33f   :  { %2683 = vmatmul.mubr.msk.f32.gmra.mrb[68].mxu0 %vm838_vm7, %v810_v54  ;;  %2798 = vmatmul.mubr.msk.f32.gmra.mrb[36].mxu1 %vm838_vm7, %v812_v4 }
 0x340   :  { %2996 = vmatpush3.bf16.msk.msra.mxu0 %vm3746_vm6, %v2994_v43  ;;  %2685 = vmatprep.mubr.msk.f32.mxu0 %vm3056_vm0, %v3057_v6  ;;  %v837_v43 = vld [vmem:[%s4404_s5 + $0xf0] sm:$0xf] }
 0x341   :  { %2800 = vmatprep.mubr.msk.f32.mxu1 %vm3056_vm0, %v3057_v6 }
 0x343   :  { %2686 = vmatmul.mubr.msk.f32.gmra.mrb[70].mxu0 %vm838_vm7, %v811_v62  ;;  %2801 = vmatmul.mubr.msk.f32.gmra.mrb[38].mxu1 %vm838_vm7, %v813_v23 }
 0x344   :  { %2688 = vmatprep.mubr.msk.f32.mxu0 %vm3056_vm0, %v3057_v6  ;;  %2803 = vmatprep.mubr.msk.f32.mxu1 %vm3056_vm0, %v3057_v6 }
 0x347   :  { %2689 = vmatmul.mubr.msk.f32.gmra.mrb[72].mxu0 %vm838_vm7, %v812_v4  ;;  %2804 = vmatmul.mubr.msk.f32.gmra.mrb[40].mxu1 %vm838_vm7, %v814_v3 }
 0x348   :  { %2691 = vmatprep.mubr.msk.f32.mxu0 %vm3056_vm0, %v3057_v6  ;;  %2806 = vmatprep.mubr.msk.f32.mxu1 %vm3056_vm0, %v3057_v6 }
 0x34b   :  { %2692 = vmatmul.mubr.msk.f32.gmra.mrb[74].mxu0 %vm838_vm7, %v813_v23  ;;  %2807 = vmatmul.mubr.msk.f32.gmra.mrb[42].mxu1 %vm838_vm7, %v815_v20 }
 0x34c   :  { %2694 = vmatprep.mubr.msk.f32.mxu0 %vm3056_vm0, %v3057_v6  ;;  %2809 = vmatprep.mubr.msk.f32.mxu1 %vm3056_vm0, %v3057_v6 }
 0x34f   :  { %2695 = vmatmul.mubr.msk.f32.gmra.mrb[76].mxu0 %vm838_vm7, %v814_v3  ;;  %2810 = vmatmul.mubr.msk.f32.gmra.mrb[44].mxu1 %vm838_vm7, %v816_v14 }
 0x350   :  { %2697 = vmatprep.mubr.msk.f32.mxu0 %vm3056_vm0, %v3057_v6  ;;  %2812 = vmatprep.mubr.msk.f32.mxu1 %vm3056_vm0, %v3057_v6 }
 0x353   :  { %2698 = vmatmul.mubr.msk.f32.gmra.mrb[78].mxu0 %vm838_vm7, %v815_v20  ;;  %2813 = vmatmul.mubr.msk.f32.gmra.mrb[46].mxu1 %vm838_vm7, %v817_v26 }
 0x354   :  { %2700 = vmatprep.mubr.msk.f32.mxu0 %vm3056_vm0, %v3057_v6  ;;  %2815 = vmatprep.mubr.msk.f32.mxu1 %vm3056_vm0, %v3057_v6 }
 0x357   :  { %2701 = vmatmul.mubr.msk.f32.gmra.mrb[80].mxu0 %vm838_vm7, %v816_v14  ;;  %2816 = vmatmul.mubr.msk.f32.gmra.mrb[48].mxu1 %vm838_vm7, %v818_v29 }
 0x358   :  { %2703 = vmatprep.mubr.msk.f32.mxu0 %vm3056_vm0, %v3057_v6  ;;  %2818 = vmatprep.mubr.msk.f32.mxu1 %vm3056_vm0, %v3057_v6 }
 0x35b   :  { %2704 = vmatmul.mubr.msk.f32.gmra.mrb[82].mxu0 %vm838_vm7, %v817_v26  ;;  %2819 = vmatmul.mubr.msk.f32.gmra.mrb[50].mxu1 %vm838_vm7, %v819_v22 }
 0x35c   :  { %2706 = vmatprep.mubr.msk.f32.mxu0 %vm3056_vm0, %v3057_v6  ;;  %2821 = vmatprep.mubr.msk.f32.mxu1 %vm3056_vm0, %v3057_v6 }
 0x35f   :  { %2707 = vmatmul.mubr.msk.f32.gmra.mrb[84].mxu0 %vm838_vm7, %v818_v29  ;;  %2822 = vmatmul.mubr.msk.f32.gmra.mrb[52].mxu1 %vm838_vm7, %v820_v57 }
 0x360   :  { %2709 = vmatprep.mubr.msk.f32.mxu0 %vm3056_vm0, %v3057_v6  ;;  %2824 = vmatprep.mubr.msk.f32.mxu1 %vm3056_vm0, %v3057_v6 }
 0x363   :  { %2710 = vmatmul.mubr.msk.f32.gmra.mrb[86].mxu0 %vm838_vm7, %v819_v22  ;;  %2825 = vmatmul.mubr.msk.f32.gmra.mrb[54].mxu1 %vm838_vm7, %v821_v34 }
 0x364   :  { %2712 = vmatprep.mubr.msk.f32.mxu0 %vm3056_vm0, %v3057_v6  ;;  %2827 = vmatprep.mubr.msk.f32.mxu1 %vm3056_vm0, %v3057_v6 }
 0x367   :  { %2713 = vmatmul.mubr.msk.f32.gmra.mrb[88].mxu0 %vm838_vm7, %v820_v57  ;;  %2828 = vmatmul.mubr.msk.f32.gmra.mrb[56].mxu1 %vm838_vm7, %v822_v63 }
 0x368   :  { %2715 = vmatprep.mubr.msk.f32.mxu0 %vm3056_vm0, %v3057_v6  ;;  %2830 = vmatprep.mubr.msk.f32.mxu1 %vm3056_vm0, %v3057_v6 }
 0x36b   :  { %2716 = vmatmul.mubr.msk.f32.gmra.mrb[90].mxu0 %vm838_vm7, %v821_v34  ;;  %2831 = vmatmul.mubr.msk.f32.gmra.mrb[58].mxu1 %vm838_vm7, %v823_v55 }
 0x36c   :  { %2718 = vmatprep.mubr.msk.f32.mxu0 %vm3056_vm0, %v3057_v6  ;;  %2833 = vmatprep.mubr.msk.f32.mxu1 %vm3056_vm0, %v3057_v6 }
 0x36f   :  { %2719 = vmatmul.mubr.msk.f32.gmra.mrb[92].mxu0 %vm838_vm7, %v822_v63  ;;  %2834 = vmatmul.mubr.msk.f32.gmra.mrb[60].mxu1 %vm838_vm7, %v824_v56 }
 0x370   :  { %2721 = vmatprep.mubr.msk.f32.mxu0 %vm3056_vm0, %v3057_v6  ;;  %2836 = vmatprep.mubr.msk.f32.mxu1 %vm3056_vm0, %v3057_v6 }
 0x373   :  { %2722 = vmatmul.mubr.msk.f32.gmra.mrb[94].mxu0 %vm838_vm7, %v823_v55  ;;  %2837 = vmatmul.mubr.msk.f32.gmra.mrb[62].mxu1 %vm838_vm7, %v825_v0 }
 0x374   :  { %2724 = vmatprep.mubr.msk.f32.mxu0 %vm3056_vm0, %v3057_v6  ;;  %2839 = vmatprep.mubr.msk.f32.mxu1 %vm3056_vm0, %v3057_v6 }
 0x377   :  { %2725 = vmatmul.mubr.msk.f32.gmra.mrb[96].mxu0 %vm838_vm7, %v824_v56  ;;  %2840 = vmatmul.mubr.msk.f32.gmra.mrb[64].mxu1 %vm838_vm7, %v826_v13 }
 0x378   :  { %2727 = vmatprep.mubr.msk.f32.mxu0 %vm3056_vm0, %v3057_v6  ;;  %2842 = vmatprep.mubr.msk.f32.mxu1 %vm3056_vm0, %v3057_v6 }
 0x37b   :  { %2728 = vmatmul.mubr.msk.f32.gmra.mrb[98].mxu0 %vm838_vm7, %v825_v0  ;;  %2843 = vmatmul.mubr.msk.f32.gmra.mrb[66].mxu1 %vm838_vm7, %v827_v12 }
 0x37c   :  { %2730 = vmatprep.mubr.msk.f32.mxu0 %vm3056_vm0, %v3057_v6  ;;  %2845 = vmatprep.mubr.msk.f32.mxu1 %vm3056_vm0, %v3057_v6 }
 0x37f   :  { %2731 = vmatmul.mubr.msk.f32.gmra.mrb[100].mxu0 %vm838_vm7, %v826_v13  ;;  %2846 = vmatmul.mubr.msk.f32.gmra.mrb[68].mxu1 %vm838_vm7, %v828_v30 }
 0x380   :  { %2733 = vmatprep.mubr.msk.f32.mxu0 %vm3056_vm0, %v3057_v6  ;;  %2848 = vmatprep.mubr.msk.f32.mxu1 %vm3056_vm0, %v3057_v6 }
 0x383   :  { %2734 = vmatmul.mubr.msk.f32.gmra.mrb[102].mxu0 %vm838_vm7, %v827_v12  ;;  %2849 = vmatmul.mubr.msk.f32.gmra.mrb[70].mxu1 %vm838_vm7, %v829_v46 }
 0x384   :  { %2736 = vmatprep.mubr.msk.f32.mxu0 %vm3056_vm0, %v3057_v6  ;;  %2851 = vmatprep.mubr.msk.f32.mxu1 %vm3056_vm0, %v3057_v6 }
 0x387   :  { %2737 = vmatmul.mubr.msk.f32.gmra.mrb[104].mxu0 %vm838_vm7, %v828_v30  ;;  %2852 = vmatmul.mubr.msk.f32.gmra.mrb[72].mxu1 %vm838_vm7, %v830_v41 }
 0x388   :  { %2739 = vmatprep.mubr.msk.f32.mxu0 %vm3056_vm0, %v3057_v6  ;;  %2854 = vmatprep.mubr.msk.f32.mxu1 %vm3056_vm0, %v3057_v6 }
 0x38b   :  { %2740 = vmatmul.mubr.msk.f32.gmra.mrb[106].mxu0 %vm838_vm7, %v829_v46  ;;  %2855 = vmatmul.mubr.msk.f32.gmra.mrb[74].mxu1 %vm838_vm7, %v831_v42 }
 0x38c   :  { %2742 = vmatprep.mubr.msk.f32.mxu0 %vm3056_vm0, %v3057_v6  ;;  %2857 = vmatprep.mubr.msk.f32.mxu1 %vm3056_vm0, %v3057_v6 }
 0x38f   :  { %2743 = vmatmul.mubr.msk.f32.gmra.mrb[108].mxu0 %vm838_vm7, %v830_v41  ;;  %2858 = vmatmul.mubr.msk.f32.gmra.mrb[76].mxu1 %vm838_vm7, %v832_v9 }
 0x390   :  { %2745 = vmatprep.mubr.msk.f32.mxu0 %vm3056_vm0, %v3057_v6  ;;  %2860 = vmatprep.mubr.msk.f32.mxu1 %vm3056_vm0, %v3057_v6 }
 0x393   :  { %2746 = vmatmul.mubr.msk.f32.gmra.mrb[110].mxu0 %vm838_vm7, %v831_v42  ;;  %2861 = vmatmul.mubr.msk.f32.gmra.mrb[78].mxu1 %vm838_vm7, %v833_v35 }
 0x394   :  { %2748 = vmatprep.mubr.msk.f32.mxu0 %vm3056_vm0, %v3057_v6  ;;  %2863 = vmatprep.mubr.msk.f32.mxu1 %vm3056_vm0, %v3057_v6 }
 0x397   :  { %2749 = vmatmul.mubr.msk.f32.gmra.mrb[112].mxu0 %vm838_vm7, %v832_v9  ;;  %2864 = vmatmul.mubr.msk.f32.gmra.mrb[80].mxu1 %vm838_vm7, %v834_v53 }
 0x398   :  { %2751 = vmatprep.mubr.msk.f32.mxu0 %vm3056_vm0, %v3057_v6  ;;  %2866 = vmatprep.mubr.msk.f32.mxu1 %vm3056_vm0, %v3057_v6 }
 0x39b   :  { %2752 = vmatmul.mubr.msk.f32.gmra.mrb[114].mxu0 %vm838_vm7, %v833_v35  ;;  %2867 = vmatmul.mubr.msk.f32.gmra.mrb[82].mxu1 %vm838_vm7, %v835_v39 }
 0x39c   :  { %2754 = vmatprep.mubr.msk.f32.mxu0 %vm3056_vm0, %v3057_v6  ;;  %2869 = vmatprep.mubr.msk.f32.mxu1 %vm3056_vm0, %v3057_v6 }
 0x39f   :  { %2755 = vmatmul.mubr.msk.f32.gmra.mrb[116].mxu0 %vm838_vm7, %v834_v53  ;;  %2870 = vmatmul.mubr.msk.f32.gmra.mrb[84].mxu1 %vm838_vm7, %v836_v47 }
 0x3a0   :  { %2757 = vmatprep.mubr.msk.f32.mxu0 %vm3056_vm0, %v3057_v6  ;;  %2872 = vmatprep.mubr.msk.f32.mxu1 %vm3056_vm0, %v3057_v6 }
 0x3a3   :  { %2758 = vmatmul.mubr.msk.f32.gmra.mrb[118].mxu0 %vm838_vm7, %v835_v39  ;;  %2873 = vmatmul.mubr.msk.f32.gmra.mrb[86].mxu1 %vm838_vm7, %v837_v43 }
 0x3a4   :  { %2760 = vmatprep.mubr.msk.f32.mxu0 %vm3056_vm0, %v3057_v6 }
 0x3a7   :  { %2761 = vmatmul.mubr.msk.f32.gmra.mrb[120].mxu0 %vm838_vm7, %v836_v47 }
 0x3a8   :  { %2763 = vmatprep.mubr.msk.f32.mxu0 %vm3056_vm0, %v3057_v6 }
 0x3ab   :  { %2764 = vmatmul.mubr.msk.f32.gmra.mrb[122].mxu0 %vm838_vm7, %v837_v43 }
 0x3ac   :  { %2782 = vmatprep.mubr.msk.f32.mxu0 %vm3056_vm0, %v3057_v6 }
 0x3af   :  { %2783 = vmatmul.mubr.msk.f32.vlgmr.msra.gmra.mrb[124].mxu0 %vm838_vm7, %v3762_v15 }
 0x3b0   :  { %2785 = vmatprep.mubr.msk.f32.mxu0 %vm3056_vm0, %v3057_v6 }
 0x3b3   :  { %2786 = vmatmul.mubr.msk.f32.gmra.mrb[126].mxu0 %vm838_vm7, %v3772_v33 }
 0x3b4   :  { %2788 = vmatprep.mubr.msk.f32.mxu0 %vm3056_vm0, %v3057_v6 }
 0x3b7   :  { %2789 = vmatmul.mubr.msk.f32.gmra.mrb[128].mxu0 %vm838_vm7, %v3788_v21 }
 0x406   :  { %v1001_v54 = vpop.f32.mrb[62].mxu0 }
 0x407   :  { %1380 = vperm.xlu0 %3013, %v1001_v54   ;;  %v2675_v62 = vpop.f32.mrb[63].mxu0 }
 0x40a   :  { %v1006_v5 = vpop.f32.mrb[64].mxu0  ;;  %v1239_v4 = vpop.f32.mrb[32].mxu1 }
 0x40b   :  { %1385 = vperm.xlu1 %3014, %v1006_v5   ;;  %v2678_v23 = vpop.f32.mrb[65].mxu0  ;;  %v2793_v15 = vpop.f32.mrb[33].mxu1 }
 0x40e   :  { %v1011_v3 = vpop.f32.mrb[66].mxu0  ;;  %v1244_v20 = vpop.f32.mrb[34].mxu1 }
 0x40f   :  { %1581 = vperm.xlu1 %3014, %v1239_v4   ;;  %v2681_v14 = vpop.f32.mrb[67].mxu0  ;;  %v2796_v26 = vpop.f32.mrb[35].mxu1  ;;  %1586 = vperm.xlu0 %3013, %v1244_v20  }
 0x412   :  { %v1016_v33 = vpop.f32.mrb[68].mxu0  ;;  %v1249_v29 = vpop.f32.mrb[36].mxu1 }
 0x413   :  { %1390 = vperm.xlu1 %3014, %v1011_v3   ;;  %v2684_v6 = vpop.f32.mrb[69].mxu0  ;;  %v2799_v22 = vpop.f32.mrb[37].mxu1 }
 0x416   :  { %v1021_v21 = vpop.f32.mrb[70].mxu0  ;;  %v1254_v57 = vpop.f32.mrb[38].mxu1 }
 0x417   :  { %1395 = vperm.xlu1 %3014, %v1016_v33   ;;  %v2802_v34 = vpop.f32.mrb[39].mxu1  ;;  %1596 = vperm.xlu0 %3013, %v1254_v57   ;;  %v2687_v63 = vpop.f32.mrb[71].mxu0 }
 0x41a   :  { %v1259_v55 = vpop.f32.mrb[40].mxu1  ;;  %v1026_v56 = vpop.f32.mrb[72].mxu0 }
 0x41b   :  { %1591 = vperm.xlu1 %3014, %v1249_v29   ;;  %v2805_v0 = vpop.f32.mrb[41].mxu1  ;;  %v2690_v13 = vpop.f32.mrb[73].mxu0 }
 0x41e   :  { %v1264_v12 = vpop.f32.mrb[42].mxu1  ;;  %v1031_v30 = vpop.f32.mrb[74].mxu0 }
 0x41f   :  { %1400 = vperm.xlu1 %3014, %v1021_v21   ;;  %v2808_v46 = vpop.f32.mrb[43].mxu1  ;;  %1606 = vperm.xlu0 %3013, %v1264_v12   ;;  %v2693_v41 = vpop.f32.mrb[75].mxu0 }
 0x422   :  { %v1269_v42 = vpop.f32.mrb[44].mxu1  ;;  %v1036_v9 = vpop.f32.mrb[76].mxu0 }
 0x423   :  { %1405 = vperm.xlu1 %3014, %v1026_v56   ;;  %v2811_v35 = vpop.f32.mrb[45].mxu1  ;;  %v2696_v53 = vpop.f32.mrb[77].mxu0 }
 0x426   :  { %v1274_v39 = vpop.f32.mrb[46].mxu1  ;;  %v1041_v47 = vpop.f32.mrb[78].mxu0 }
 0x427   :  { %1616 = vperm.xlu0 %3013, %v1274_v39   ;;  %1601 = vperm.xlu1 %3014, %v1259_v55   ;;  %v2699_v43 = vpop.f32.mrb[79].mxu0  ;;  %v2814_v54 = vpop.f32.mrb[47].mxu1 }
 0x42a   :  { %v1046_v62 = vpop.f32.mrb[80].mxu0  ;;  %v1279_v5 = vpop.f32.mrb[48].mxu1 }
 0x42b   :  { %1410 = vperm.xlu1 %3014, %v1031_v30   ;;  %1425 = vperm.xlu0 %3013, %v1046_v62   ;;  %v2817_v4 = vpop.f32.mrb[49].mxu1  ;;  %v2702_v23 = vpop.f32.mrb[81].mxu0 }
 0x42e   :  { %v1284_v15 = vpop.f32.mrb[50].mxu1  ;;  %v1051_v3 = vpop.f32.mrb[82].mxu0 }
 0x42f   :  { %1415 = vperm.xlu1 %3014, %v1036_v9   ;;  %1626 = vperm.xlu0 %3013, %v1284_v15   ;;  %v2705_v20 = vpop.f32.mrb[83].mxu0  ;;  %v2820_v14 = vpop.f32.mrb[51].mxu1 }
 0x432   :  { %v1056_v26 = vpop.f32.mrb[84].mxu0  ;;  %v1289_v33 = vpop.f32.mrb[52].mxu1 }
 0x433   :  { %1611 = vperm.xlu1 %3014, %v1269_v42   ;;  %1435 = vperm.xlu0 %3013, %v1056_v26   ;;  %v2823_v29 = vpop.f32.mrb[53].mxu1  ;;  %v2708_v6 = vpop.f32.mrb[85].mxu0 }
 0x436   :  { %v1294_v22 = vpop.f32.mrb[54].mxu1  ;;  %v1061_v21 = vpop.f32.mrb[86].mxu0 }
 0x437   :  { %1420 = vperm.xlu1 %3014, %v1041_v47   ;;  %1636 = vperm.xlu0 %3013, %v1294_v22   ;;  %v2711_v57 = vpop.f32.mrb[87].mxu0  ;;  %v2826_v34 = vpop.f32.mrb[55].mxu1 }
 0x43a   :  { %v1066_v63 = vpop.f32.mrb[88].mxu0  ;;  %v1299_v55 = vpop.f32.mrb[56].mxu1 }
 0x43b   :  { %1621 = vperm.xlu1 %3014, %v1279_v5   ;;  %1445 = vperm.xlu0 %3013, %v1066_v63   ;;  %v2829_v56 = vpop.f32.mrb[57].mxu1  ;;  %v2714_v0 = vpop.f32.mrb[89].mxu0 }
 0x43e   :  { %v1304_v13 = vpop.f32.mrb[58].mxu1  ;;  %v1071_v12 = vpop.f32.mrb[90].mxu0 }
 0x43f   :  { %1430 = vperm.xlu1 %3014, %v1051_v3   ;;  %1646 = vperm.xlu0 %3013, %v1304_v13   ;;  %v2717_v30 = vpop.f32.mrb[91].mxu0  ;;  %v2832_v46 = vpop.f32.mrb[59].mxu1 }
 0x440   :  { %v1781_v46 = vlaneseq }
 0x442   :  { %v1076_v41 = vpop.f32.mrb[92].mxu0  ;;  %v1309_v42 = vpop.f32.mrb[60].mxu1 }
 0x443   :  { %1631 = vperm.xlu1 %3014, %v1289_v33   ;;  %1455 = vperm.xlu0 %3013, %v1076_v41   ;;  %v2835_v9 = vpop.f32.mrb[61].mxu1  ;;  %v2720_v35 = vpop.f32.mrb[93].mxu0 }
 0x446   :  { %v1314_v53 = vpop.f32.mrb[62].mxu1  ;;  %v1081_v39 = vpop.f32.mrb[94].mxu0 }
 0x447   :  { %1440 = vperm.xlu1 %3014, %v1061_v21   ;;  %1656 = vperm.xlu0 %3013, %v1314_v53   ;;  %v2723_v47 = vpop.f32.mrb[95].mxu0  ;;  %v2838_v43 = vpop.f32.mrb[63].mxu1  ;;  %v4054_v53 = vshrl.u32 %v1781_v46, 7 }
 0x44a   :  { %v1086_v54 = vpop.f32.mrb[96].mxu0  ;;  %v1319_v62 = vpop.f32.mrb[64].mxu1 }
 0x44b   :  { %1641 = vperm.xlu1 %3014, %v1299_v55   ;;  %1465 = vperm.xlu0 %3013, %v1086_v54   ;;  %v2841_v5 = vpop.f32.mrb[65].mxu1  ;;  %v2726_v4 = vpop.f32.mrb[97].mxu0 }
 0x44c   :  { %v1786_v5 = vadd.s32 32, %v4054_v53 }
 0x44e   :  { %v1324_v23 = vpop.f32.mrb[66].mxu1  ;;  %v1091_v15 = vpop.f32.mrb[98].mxu0 }
 0x44f   :  { %1450 = vperm.xlu1 %3014, %v1071_v12   ;;  %1666 = vperm.xlu0 %3013, %v1324_v23   ;;  %v2729_v3 = vpop.f32.mrb[99].mxu0  ;;  %v2844_v20 = vpop.f32.mrb[67].mxu1 }
 0x450   :  { %v4058_v20 = vand.u32 127, %v1781_v46 }
 0x452   :  { %v1096_v14 = vpop.f32.mrb[100].mxu0  ;;  %v1329_v26 = vpop.f32.mrb[68].mxu1 }
 0x453   :  { %1651 = vperm.xlu1 %3014, %v1309_v42   ;;  %1475 = vperm.xlu0 %3013, %v1096_v14   ;;  %v2847_v33 = vpop.f32.mrb[69].mxu1  ;;  %v2732_v29 = vpop.f32.mrb[101].mxu0 }
 0x454   :  { %v1787_v33 = vadd.s32 40, %v4054_v53 }
 0x456   :  { %v1334_v6 = vpop.f32.mrb[70].mxu1  ;;  %v1101_v22 = vpop.f32.mrb[102].mxu0 }
 0x457   :  { %1460 = vperm.xlu1 %3014, %v1081_v39   ;;  %1676 = vperm.xlu0 %3013, %v1334_v6   ;;  %v2735_v21 = vpop.f32.mrb[103].mxu0  ;;  %v2850_v57 = vpop.f32.mrb[71].mxu1 }
 0x45a   :  { %v1106_v34 = vpop.f32.mrb[104].mxu0  ;;  %v1339_v63 = vpop.f32.mrb[72].mxu1 }
 0x45b   :  { %1661 = vperm.xlu1 %3014, %v1319_v62   ;;  %1485 = vperm.xlu0 %3013, %v1106_v34   ;;  %v2853_v55 = vpop.f32.mrb[73].mxu1  ;;  %v2738_v56 = vpop.f32.mrb[105].mxu0  ;;  %v1785_v62 = vadd.s32 24, %v4054_v53 }
 0x45c   :  { %v1788_v55 = vadd.s32 48, %v4054_v53  ;;  %v1789_v56 = vadd.s32 56, %v4054_v53 }
 0x45d   :  { %v1818_v14 = vmul.u32 128, %v1785_v62 }
 0x45e   :  { %v1344_v0 = vpop.f32.mrb[74].mxu1  ;;  %v1111_v13 = vpop.f32.mrb[106].mxu0 }
 0x45f   :  { %1470 = vperm.xlu1 %3014, %v1091_v15   ;;  %1686 = vperm.xlu0 %3013, %v1344_v0   ;;  %v2741_v12 = vpop.f32.mrb[107].mxu0  ;;  %v2856_v30 = vpop.f32.mrb[75].mxu1  ;;  %v1849_v57 = vadd.s32 %v1818_v14, %v4058_v20 }
 0x462   :  { %v1116_v41 = vpop.f32.mrb[108].mxu0  ;;  %v1349_v42 = vpop.f32.mrb[76].mxu1 }
 0x463   :  { %1671 = vperm.xlu1 %3014, %v1329_v26   ;;  %1495 = vperm.xlu0 %3013, %v1116_v41   ;;  %v2859_v9 = vpop.f32.mrb[77].mxu1  ;;  %v2744_v35 = vpop.f32.mrb[109].mxu0  ;;  %v1819_v26 = vmul.u32 128, %v1786_v5  ;;  %v4070_v41 = vstv %s4399_s0  ;;  %v1791_v5 = vadd.s32 72, %v4054_v53  ;;  %s3060_s0 = smov [#allocation3]  }
 0x464   :  { %s2318_s22 = sshll.u32 %s3060_s0, 4  ;;  %s2319_s22 = int_to_ptr.vmem [resolvable:$true] %s2318_s22 }
 0x465   :  { %v1850_v34 = vadd.s32 %v1819_v26, %v4058_v20  ;;  %s3031_s23 = scalar_lea.vmem %s2319_s22, 3968  ;;  %p3036_p1 = scmp.lt.s32.totalorder %s2319_s22, %s2319_s22 }
 0x466   :  { %v1354_v39 = vpop.f32.mrb[78].mxu1  ;;  %v1121_v47 = vpop.f32.mrb[110].mxu0  ;;  %p3032_p0 = scmp.ne.s32.totalorder %s2319_s22, %s3031_s23  ;;  %p3037_p2 = scmp.lt.s32.totalorder %s3031_s23, %s3031_s23 }
 0x467   :  { %1480 = vperm.xlu1 %3014, %v1101_v22   ;;  %1696 = vperm.xlu0 %3013, %v1354_v39   ;;  %v2747_v43 = vpop.f32.mrb[111].mxu0  ;;  %v2862_v54 = vpop.f32.mrb[79].mxu1  ;;  %v1881_v9 = vmul.u32 2654435769, %v1850_v34  ;;  %v1821_v39 = vmul.u32 128, %v1788_v55 }
 0x468   :  { %v1822_v43 = vmul.u32 128, %v1789_v56  ;;  %p3038_p3 = por %p3037_p2, %p3036_p1 }
 0x469   :  { %v1852_v26 = vadd.s32 %v1821_v39, %v4058_v20 }
 0x46a   :  { %v1126_v4 = vpop.f32.mrb[112].mxu0  ;;  %v1359_v23 = vpop.f32.mrb[80].mxu1  ;;  %p3039_p4 = pnand %p3038_p3, %p3032_p0 }
 0x46b   :  { %1681 = vperm.xlu1 %3014, %v1339_v63   ;;  %1505 = vperm.xlu0 %3013, %v1126_v4   ;;  %v2865_v15 = vpop.f32.mrb[81].mxu1  ;;  %v2750_v3 = vpop.f32.mrb[113].mxu0  ;;  %v1820_v63 = vmul.u32 128, %v1787_v33  ;;  %v1853_v33 = vadd.s32 %v1822_v43, %v4058_v20  ;;  %v1883_v55 = vmul.u32 2654435769, %v1852_v26 }
 0x46c   :  { %v1914_v3 = vadd.s32 %v4070_v41, %v1881_v9  ;;  %v1792_v9 = vadd.s32 80, %v4054_v53 }
 0x46d   :  { %v1851_v35 = vadd.s32 %v1820_v63, %v4058_v20  ;;  %v1884_v56 = vmul.u32 2654435769, %v1853_v33 }
 0x46e   :  { %v1364_v29 = vpop.f32.mrb[82].mxu1  ;;  %v1131_v6 = vpop.f32.mrb[114].mxu0 }
 0x46f   :  { %1490 = vperm.xlu1 %3014, %v1111_v13   ;;  %1706 = vperm.xlu0 %3013, %v1364_v29   ;;  %v2753_v22 = vpop.f32.mrb[115].mxu0  ;;  %v2868_v21 = vpop.f32.mrb[83].mxu1  ;;  %v1880_v13 = vmul.u32 2654435769, %v1849_v57  ;;  %v1882_v14 = vmul.u32 2654435769, %v1851_v35 }
 0x470   :  { %v1824_v22 = vmul.u32 128, %v1791_v5  ;;  %v1790_v21 = vadd.s32 64, %v4054_v53  ;;  %v1916_v5 = vadd.s32 %v4070_v41, %v1883_v55 }
 0x471   :  { %v1913_v4 = vadd.s32 %v4070_v41, %v1880_v13  ;;  %v1915_v63 = vadd.s32 %v4070_v41, %v1882_v14  ;;  %v1795_v14 = vadd.s32 104, %v4054_v53 }
 0x472   :  { %v1136_v0 = vpop.f32.mrb[116].mxu0  ;;  %v4065_v12 = vpop.f32.mrb[84].mxu1  ;;  %v1823_v13 = vmul.u32 128, %v1790_v21 }
 0x473   :  { %1691 = vperm.xlu1 %3014, %v1349_v42   ;;  %1515 = vperm.xlu0 %3013, %v1136_v0   ;;  %v2756_v30 = vpop.f32.mrb[117].mxu0  ;;  %v2871_v46 = vpop.f32.mrb[85].mxu1  ;;  %v1944_v34 = vshrl.u32 %v1913_v4, 16  ;;  %v1793_v0 = vadd.s32 88, %v4054_v53  ;;  %v1946_v43 = vshrl.u32 %v1915_v63, 16  ;;  %v1828_v55 = vmul.u32 128, %v1795_v14 }
 0x474   :  { %v1855_v46 = vadd.s32 %v1824_v22, %v4058_v20  ;;  %v1825_v22 = vmul.u32 128, %v1792_v9 }
 0x475   :  { %v1975_v39 = vxor.u32 %v1944_v34, %v1913_v4  ;;  %v1977_v4 = vxor.u32 %v1946_v43, %v1915_v63 }
 0x476   :  { %v1141_v54 = vpop.f32.mrb[118].mxu0  ;;  %v4073_v62 = vpop.f32.mrb[86].mxu1  ;;  %v1886_v33 = vmul.u32 2654435769, %v1855_v46  ;;  %v1856_v46 = vadd.s32 %v1825_v22, %v4058_v20 }
 0x477   :  { %1500 = vperm.xlu1 %3014, %v1121_v47   ;;  %v2759_v42 = vpop.f32.mrb[119].mxu0  ;;  %v2874_v15 = vpop.f32.mrb[87].mxu1  ;;  %v1945_v47 = vshrl.u32 %v1914_v3, 16 }
 0x478   :  { %v1917_v42 = vadd.s32 %v4070_v41, %v1884_v56  ;;  %v1826_v15 = vmul.u32 128, %v1793_v0  ;;  %v1919_v0 = vadd.s32 %v4070_v41, %v1886_v33 }
 0x47a   :  { %v1146_v29 = vpop.f32.mrb[120].mxu0  ;;  %v1948_v34 = vshrl.u32 %v1917_v42, 16  ;;  %v1950_v48 = vshrl.u32 %v1919_v0, 16 }
 0x47b   :  { %1701 = vperm.xlu1 %3014, %v1359_v23   ;;  %1525 = vperm.xlu0 %3013, %v1146_v29   ;;  %v2762_v57 = vpop.f32.mrb[121].mxu0  ;;  %v1976_v23 = vxor.u32 %v1945_v47, %v1914_v3  ;;  %v1854_v29 = vadd.s32 %v1823_v13, %v4058_v20  ;;  %v1947_v3 = vshrl.u32 %v1916_v5, 16  ;;  %v1857_v47 = vadd.s32 %v1826_v15, %v4058_v20 }
 0x47c   :  { %v1794_v13 = vadd.s32 96, %v4054_v53  ;;  %v1979_v63 = vxor.u32 %v1948_v34, %v1917_v42  ;;  %v1981_v51 = vxor.u32 %v1950_v48, %v1919_v0 }
 0x47d   :  { %v2007_v57 = vmul.u32 2146121005, %v1976_v23  ;;  %v1978_v23 = vxor.u32 %v1947_v3, %v1916_v5  ;;  %v1888_v43 = vmul.u32 2654435769, %v1857_v47 }
 0x47e   :  { %v1151_v30 = vpop.f32.mrb[122].mxu0  ;;  %v1827_v22 = vmul.u32 128, %v1794_v13  ;;  %v2010_v3 = vmul.u32 2146121005, %v1979_v63 }
 0x47f   :  { %1510 = vperm.xlu1 %3014, %v1131_v6   ;;  %v2765_v35 = vpop.f32.mrb[123].mxu0  ;;  %v2006_v6 = vmul.u32 2146121005, %v1975_v39  ;;  %v2008_v39 = vmul.u32 2146121005, %v1977_v4  ;;  %v1921_v34 = vadd.s32 %v4070_v41, %v1888_v43 }
 0x480   :  { %v1885_v35 = vmul.u32 2654435769, %v1854_v29  ;;  %v1887_v29 = vmul.u32 2654435769, %v1856_v46  ;;  %v1858_v46 = vadd.s32 %v1827_v22, %v4058_v20 }
 0x481   :  { %v2037_v9 = vshrl.u32 %v2006_v6, 15  ;;  %v2039_v5 = vshrl.u32 %v2008_v39, 15  ;;  %v2009_v42 = vmul.u32 2146121005, %v1978_v23  ;;  %v2012_v0 = vmul.u32 2146121005, %v1981_v51 }
 0x482   :  { %v1224_v26 = vpop.f32.mrb[124].mxu0  ;;  %v1918_v33 = vadd.s32 %v4070_v41, %v1885_v35  ;;  %v1920_v35 = vadd.s32 %v4070_v41, %v1887_v29 }
 0x483   :  { %1520 = vperm.xlu1 %3014, %v1141_v54   ;;  %1566 = vperm.xlu0 %3013, %v1224_v26   ;;  %v2784_v21 = vpop.f32.mrb[125].mxu0  ;;  %v2038_v26 = vshrl.u32 %v2007_v57, 15  ;;  %v2040_v13 = vshrl.u32 %v2009_v42, 15  ;;  %v2043_v36 = vshrl.u32 %v2012_v0, 15 }
 0x484   :  { %v1859_v21 = vadd.s32 %v1828_v55, %v4058_v20 }
 0x485   :  { %v2069_v4 = vxor.u32 %v2038_v26, %v2007_v57  ;;  %v1952_v26 = vshrl.u32 %v1921_v34, 16 }
 0x486   :  { %v1229_v56 = vpop.f32.mrb[126].mxu0  ;;  %v1890_v47 = vmul.u32 2654435769, %v1859_v21  ;;  %v4104_v63 = vpop.permute.xlu0 %1380  ;;  %v1951_v21 = vshrl.u32 %v1920_v35, 16 }
 0x487   :  { %1530 = vperm.xlu1 %3014, %v1151_v30   ;;  %v2787_v54 = vpop.f32.mrb[127].mxu0  ;;  %v2068_v30 = vxor.u32 %v2037_v9, %v2006_v6  ;;  %v2100_v57 = vmul.u32 2221713035, %v2069_v4  ;;  %v2041_v9 = vshrl.u32 %v2010_v3, 15  ;;  %4427 = vst [vmem:[#allocation15_spill] sm:$0xff] %v4104_v63  ;;  %v1983_v4 = vxor.u32 %v1952_v26, %v1921_v34 }
 0x488   :  { %v1797_v54 = vadd.s32 120, %v4054_v53  ;;  %v1923_v23 = vadd.s32 %v4070_v41, %v1890_v47 }
 0x489   :  { %v2099_v6 = vmul.u32 2221713035, %v2068_v30  ;;  %v2131_v29 = vshrl.u32 %v2100_v57, 16  ;;  %v2071_v30 = vxor.u32 %v2040_v13, %v2009_v42  ;;  %v2014_v26 = vmul.u32 2146121005, %v1983_v4 }
 0x48a   :  { %v4094_v15 = vpop.permute.xlu1 %1385  ;;  %v1234_v14 = vpop.f32.mrb[128].mxu0 }
 0x48b   :  { %4426 = vst [vmem:[#allocation14_spill] sm:$0xff] %v4094_v15  ;;  %1571 = vperm.xlu1 %3014, %v1229_v56   ;;  %1576 = vperm.xlu0 %3013, %v1234_v14   ;;  %v2790_v37 = vpop.f32.mrb[129].mxu0  ;;  %v1949_v15 = vshrl.u32 %v1918_v33, 16  ;;  %v2070_v56 = vxor.u32 %v2039_v5, %v2008_v39  ;;  %v1889_v14 = vmul.u32 2654435769, %v1858_v46  ;;  %v1796_v39 = vadd.s32 112, %v4054_v53 }
 0x48c   :  { %v1830_v37 = vmul.u32 128, %v1797_v54  ;;  %v2072_v54 = vxor.u32 %v2041_v9, %v2010_v3  ;;  %v1954_v5 = vshrl.u32 %v1923_v23, 16  ;;  %v2102_v13 = vmul.u32 2221713035, %v2071_v30 }
 0x48d   :  { %v1980_v43 = vxor.u32 %v1949_v15, %v1918_v33  ;;  %v2101_v22 = vmul.u32 2221713035, %v2070_v56  ;;  %v1922_v51 = vadd.s32 %v4070_v41, %v1889_v14  ;;  %v4113_v56 = vxor.u32 %v2131_v29, %v2100_v57 }
 0x48e   :  { %v1582_v55 = vpop.permute.xlu1 %1581  ;;  %v1587_v45 = vpop.permute.xlu0 %1586  ;;  %v1829_v3 = vmul.u32 128, %v1796_v39  ;;  %v2103_v9 = vmul.u32 2221713035, %v2072_v54  ;;  %v1985_v44 = vxor.u32 %v1954_v5, %v1923_v23  ;;  %v1798_v29 = vadd.s32 128, %v4054_v53 }
 0x48f   :  { %1711 = vperm.xlu1 %3014, %v4065_v12   ;;  %1716 = vperm.xlu0 %3013, %v4073_v62   ;;  %v2130_v12 = vshrl.u32 %v2099_v6, 16  ;;  %v1861_v62 = vadd.s32 %v1830_v37, %v4058_v20  ;;  %v2011_v63 = vmul.u32 2146121005, %v1980_v43  ;;  %v1799_v37 = vadd.s32 136, %v4054_v53 }
 0x490   :  { %v2132_v42 = vshrl.u32 %v2101_v22, 16  ;;  %vm2193_vm9 = vcmp.ge.u32.totalorder %v4113_v56, 429496729  ;;  %v1860_v23 = vadd.s32 %v1829_v3, %v4058_v20  ;;  %v2016_v39 = vmul.u32 2146121005, %v1985_v44 }
 0x491   :  { %v2161_v15 = vxor.u32 %v2130_v12, %v2099_v6  ;;  %v1892_v46 = vmul.u32 2654435769, %v1861_v62  ;;  %v2042_v6 = vshrl.u32 %v2011_v63, 15  ;;  %v1832_v12 = vmul.u32 128, %v1799_v37 }
 0x492   :  { %v4106_v48 = vpop.permute.xlu1 %1390  ;;  %v4121_v62 = vxor.u32 %v2132_v42, %v2101_v22  ;;  %v1891_v44 = vmul.u32 2654435769, %v1860_v23 }
 0x493   :  { %4428 = vst [vmem:[#allocation16_spill] sm:$0xff] %v4106_v48  ;;  %v1982_v48 = vxor.u32 %v1951_v21, %v1920_v35  ;;  %v4117_v35 = vxor.u32 %v2043_v36, %v2012_v0  ;;  %vm2192_vm8 = vcmp.ge.u32.totalorder %v2161_v15, 429496729  ;;  %v1925_v57 = vadd.s32 %v4070_v41, %v1892_v46 }
 0x494   :  { %v2134_v36 = vshrl.u32 %v2103_v9, 16  ;;  %v2045_v0 = vshrl.u32 %v2014_v26, 15  ;;  %v2073_v4 = vxor.u32 %v2042_v6, %v2011_v63  ;;  %v1863_v37 = vadd.s32 %v1832_v12, %v4058_v20 }
 0x495   :  { %v2013_v21 = vmul.u32 2146121005, %v1982_v48  ;;  %v2105_v54 = vmul.u32 2221713035, %v4117_v35  ;;  %v1956_v46 = vshrl.u32 %v1925_v57, 16  ;;  %v2047_v15 = vshrl.u32 %v2016_v39, 15 }
 0x496   :  { %v1396_v47 = vpop.permute.xlu1 %1395  ;;  %v4115_v43 = vpop.permute.xlu0 %1596  ;;  %vm2194_vm10 = vcmp.ge.u32.totalorder %v4121_v62, 429496729  ;;  %v4134_v63 = vxor.u32 %v2134_v36, %v2103_v9  ;;  %v1801_v12 = vadd.s32 152, %v4054_v53  ;;  %v1894_v28 = vmul.u32 2654435769, %v1863_v37 }
 0x497   :  { %v1536_v33 = vmul.f32 %v1396_v47, %v3337_v52  ;;  %v1953_v52 = vshrl.u32 %v1922_v51, 16  ;;  %v2044_v5 = vshrl.u32 %v2013_v21, 15  ;;  %v1800_v9 = vadd.s32 144, %v4054_v53 }
 0x498   :  { %v4141_v36 = vxor.u32 %v2047_v15, %v2016_v39  ;;  %v1927_v37 = vadd.s32 %v4070_v41, %v1894_v28  ;;  %vm2196_vm12 = vcmp.ge.u32.totalorder %v4134_v63, 429496729 }
 0x499   :  { %v1722_v34 = vadd.f32 %v1582_v55, %v1536_v33  ;;  %v2133_v55 = vshrl.u32 %v2102_v13, 16  ;;  %v1984_v47 = vxor.u32 %v1953_v52, %v1922_v51  ;;  %v2076_v51 = vxor.u32 %v2045_v0, %v2014_v26 }
 0x49a   :  { %v1592_v27 = vpop.permute.xlu1 %1591  ;;  %v2104_v52 = vmul.u32 2221713035, %v2073_v4  ;;  %v2109_v15 = vmul.u32 2221713035, %v4141_v36 }
 0x49b   :  { %v1753_v14 = vmax.f32 %v1722_v34, 0.0  ;;  %v4132_v3 = vxor.u32 %v2133_v55, %v2102_v13  ;;  %v1831_v34 = vmul.u32 128, %v1798_v29  ;;  %v2136_v13 = vshrl.u32 %v2105_v54, 16 }
 0x49c   :  { %v1924_v55 = vadd.s32 %v4070_v41, %v1891_v44  ;;  %v2107_v29 = vmul.u32 2221713035, %v2076_v51  ;;  %v2135_v4 = vshrl.u32 %v2104_v52, 16  ;;  %v2140_v62 = vshrl.u32 %v2109_v15, 16 }
 0x49d   :  { %v2223_v30 = vmul.f32 1.1111112, %v1753_v14  ;;  %v2015_v14 = vmul.u32 2146121005, %v1984_v47  ;;  %vm2195_vm11 = vcmp.ge.u32.totalorder %v4132_v3, 429496729 }
 0x49e   :  { %v1401_v48 = vpop.permute.xlu1 %1400  ;;  %v4129_v42 = vpop.permute.xlu0 %1606  ;;  %v1955_v39 = vshrl.u32 %v1924_v55, 16  ;;  %v2138_v51 = vshrl.u32 %v2107_v29, 16 }
 0x49f   :  { %v2254_v33 = vsel %vm2192_vm8, %v2223_v30, 0.0  ;;  %v1537_v22 = vmul.f32 %v1401_v48, %v3343_v58  ;;  %v2075_v58 = vxor.u32 %v2044_v5, %v2013_v21 }
 0x4a0   :  { %2285 = vst [vmem:[#allocation3 + $0x18] sm:$0xff] %v2254_v33  ;;  %v1987_v33 = vxor.u32 %v1956_v46, %v1925_v57  ;;  %v1834_v57 = vmul.u32 128, %v1801_v12  ;;  %v4153_v12 = vxor.u32 %v2135_v4, %v2104_v52  ;;  %v4166_v4 = vxor.u32 %v2138_v51, %v2107_v29 }
 0x4a1   :  { %v1723_v35 = vadd.f32 %v1587_v45, %v1537_v22  ;;  %v1862_v45 = vadd.s32 %v1831_v34, %v4058_v20  ;;  %v2106_v5 = vmul.u32 2221713035, %v2075_v58  ;;  %v1833_v34 = vmul.u32 128, %v1800_v9 }
 0x4a2   :  { %v1406_v6 = vpop.permute.xlu1 %1405  ;;  %v2018_v46 = vmul.u32 2146121005, %v1987_v33  ;;  %v1865_v28 = vadd.s32 %v1834_v57, %v4058_v20  ;;  %vm2197_vm14 = vcmp.ge.u32.totalorder %v4153_v12, 429496729  ;;  %vm2200_vm15 = vcmp.ge.u32.totalorder %v4166_v4, 429496729 }
 0x4a3   :  { %v1754_v30 = vmax.f32 %v1723_v35, 0.0  ;;  %v1538_v48 = vmul.f32 %v1406_v6, %v3346_v59  ;;  %v2046_v59 = vshrl.u32 %v2015_v14, 15  ;;  %v1893_v44 = vmul.u32 2654435769, %v1862_v45 }
 0x4a4   :  { %v1803_v6 = vadd.s32 168, %v4054_v53  ;;  %v1958_v45 = vshrl.u32 %v1927_v37, 16  ;;  %v2049_v9 = vshrl.u32 %v2018_v46, 15 }
 0x4a5   :  { %v2224_v26 = vmul.f32 1.1111112, %v1754_v30  ;;  %v1724_v23 = vadd.f32 %v1592_v27, %v1538_v48  ;;  %v4149_v27 = vxor.u32 %v2136_v13, %v2105_v54  ;;  %v2137_v30 = vshrl.u32 %v2106_v5, 16 }
 0x4a6   :  { %v4143_v21 = vpop.permute.xlu0 %1616  ;;  %v1602_v0 = vpop.permute.xlu1 %1601  ;;  %v1802_v48 = vadd.s32 160, %v4054_v53  ;;  %v4160_v13 = vxor.u32 %v2046_v59, %v2015_v14  ;;  %v1926_v52 = vadd.s32 %v4070_v41, %v1893_v44  ;;  %v1836_v57 = vmul.u32 128, %v1803_v6 }
 0x4a7   :  { %v2255_v47 = vsel %vm2193_vm9, %v2224_v26, 0.0  ;;  %v1755_v22 = vmax.f32 %v1724_v23, 0.0  ;;  %v1986_v26 = vxor.u32 %v1955_v39, %v1924_v55  ;;  %v1864_v23 = vadd.s32 %v1833_v34, %v4058_v20 }
 0x4a8   :  { %2286 = vst [vmem:[#allocation3 + $0x20] sm:$0xff] %v2255_v47  ;;  %vm2198_vm13 = vcmp.ge.u32.totalorder %v4149_v27, 429496729  ;;  %v4171_v14 = vxor.u32 %v2137_v30, %v2106_v5  ;;  %v1896_v59 = vmul.u32 2654435769, %v1865_v28  ;;  %v1805_v55 = vadd.s32 184, %v4054_v53 }
 0x4a9   :  { %v2225_v35 = vmul.f32 1.1111112, %v1755_v22  ;;  %v1835_v22 = vmul.u32 128, %v1802_v48  ;;  %v1989_v29 = vxor.u32 %v1958_v45, %v1927_v37  ;;  %v4176_v34 = vxor.u32 %v2049_v9, %v2018_v46 }
 0x4aa   :  { %v1411_v56 = vpop.permute.xlu1 %1410  ;;  %v1426_v58 = vpop.permute.xlu0 %1425  ;;  %v1957_v51 = vshrl.u32 %v1926_v52, 16  ;;  %v1895_v6 = vmul.u32 2654435769, %v1864_v23  ;;  %v1867_v30 = vadd.s32 %v1836_v57, %v4058_v20  ;;  %v1838_v37 = vmul.u32 128, %v1805_v55 }
 0x4ab   :  { %v2256_v54 = vsel %vm2194_vm10, %v2225_v35, 0.0  ;;  %v1539_v33 = vmul.f32 %v1411_v56, %v3352_v1  ;;  %v2017_v35 = vmul.u32 2146121005, %v1986_v26  ;;  %v2020_v26 = vmul.u32 2146121005, %v1989_v29 }
 0x4ac   :  { %2287 = vst [vmem:[#allocation3 + $0x28] sm:$0xff] %v2256_v54  ;;  %v1542_v54 = vmul.f32 %v1426_v58, %v3364_v11  ;;  %v2111_v11 = vmul.u32 2221713035, %v4176_v34  ;;  %v1988_v58 = vxor.u32 %v1957_v51, %v1926_v52  ;;  %v1898_v57 = vmul.u32 2654435769, %v1867_v30 }
 0x4ad   :  { %v1725_v36 = vadd.f32 %v4115_v43, %v1539_v33  ;;  %v2108_v43 = vmul.u32 2221713035, %v4160_v13  ;;  %v4180_v33 = vxor.u32 %v2140_v62, %v2109_v15  ;;  %v1866_v13 = vadd.s32 %v1835_v22, %v4058_v20 }
 0x4ae   :  { %v1416_v47 = vpop.permute.xlu1 %1415  ;;  %v4168_v1 = vpop.permute.xlu0 %1626  ;;  %v1928_v15 = vadd.s32 %v4070_v41, %v1895_v6  ;;  %v1869_v55 = vadd.s32 %v1838_v37, %v4058_v20  ;;  %v2051_v34 = vshrl.u32 %v2020_v26, 15  ;;  %v2142_v51 = vshrl.u32 %v2111_v11, 16 }
 0x4af   :  { %v1756_v39 = vmax.f32 %v1725_v36, 0.0  ;;  %v1540_v44 = vmul.f32 %v1416_v47, %v3355_v2  ;;  %v1929_v2 = vadd.s32 %v4070_v41, %v1896_v59  ;;  %v2139_v62 = vshrl.u32 %v2108_v43, 16 }
 0x4b0   :  { %v1897_v22 = vmul.u32 2654435769, %v1866_v13  ;;  %v1931_v63 = vadd.s32 %v4070_v41, %v1898_v57  ;;  %v4207_v27 = vxor.u32 %v2051_v34, %v2020_v26  ;;  %vm2199_vm0 = vcmp.ge.u32.totalorder %v4171_v14, 429496729 }
 0x4b1   :  { %v2226_v56 = vmul.f32 1.1111112, %v1756_v39  ;;  %v1726_v5 = vadd.f32 %v1602_v0, %v1540_v44  ;;  %v2048_v0 = vshrl.u32 %v2017_v35, 15  ;;  %v1960_v3 = vshrl.u32 %v1929_v2, 16 }
 0x4b2   :  { %v1612_v28 = vpop.permute.xlu1 %1611  ;;  %v1436_v48 = vpop.permute.xlu0 %1435  ;;  %v1804_v39 = vadd.s32 176, %v4054_v53  ;;  %vm2202_vm1 = vcmp.ge.u32.totalorder %v4180_v33, 429496729 }
 0x4b3   :  { %v2257_v46 = vsel %vm2195_vm11, %v2226_v56, 0.0  ;;  %v1757_v45 = vmax.f32 %v1726_v5, 0.0  ;;  %v1728_v9 = vadd.f32 %v1612_v28, %v1542_v54  ;;  %v4197_v6 = vxor.u32 %v2048_v0, %v2017_v35 }
 0x4b4   :  { %2288 = vst [vmem:[#allocation3 + $0x30] sm:$0xff] %v2257_v46  ;;  %v2019_v56 = vmul.u32 2146121005, %v1988_v58  ;;  %v1959_v54 = vshrl.u32 %v1928_v15, 16  ;;  %v1544_v30 = vmul.f32 %v1436_v48, %v3373_v18  ;;  %v1930_v46 = vadd.s32 %v4070_v41, %v1897_v22 }
 0x4b5   :  { %v2227_v23 = vmul.f32 1.1111112, %v1757_v45  ;;  %v1759_v36 = vmax.f32 %v1728_v9, 0.0  ;;  %v1900_v45 = vmul.u32 2654435769, %v1869_v55  ;;  %v1837_v35 = vmul.u32 128, %v1804_v39 }
 0x4b6   :  { %v1421_v47 = vpop.permute.xlu1 %1420  ;;  %v4189_v59 = vpop.permute.xlu0 %1636  ;;  %v4205_v58 = vxor.u32 %v2139_v62, %v2108_v43  ;;  %v2110_v18 = vmul.u32 2221713035, %v4197_v6  ;;  %v2050_v48 = vshrl.u32 %v2019_v56, 15  ;;  %v1961_v39 = vshrl.u32 %v1930_v46, 16 }
 0x4b7   :  { %v2258_v52 = vsel %vm2196_vm12, %v2227_v23, 0.0  ;;  %v2229_v44 = vmul.f32 1.1111112, %v1759_v36  ;;  %v1541_v29 = vmul.f32 %v1421_v47, %v3361_v10  ;;  %v1991_v10 = vxor.u32 %v1960_v3, %v1929_v2 }
 0x4b8   :  { %2289 = vst [vmem:[#allocation3 + $0x38] sm:$0xff] %v2258_v52  ;;  %v1807_v23 = vadd.s32 200, %v4054_v53  ;;  %v4211_v47 = vxor.u32 %v2142_v51, %v2111_v11  ;;  %v1962_v2 = vshrl.u32 %v1931_v63, 16  ;;  %v1933_v43 = vadd.s32 %v4070_v41, %v1900_v45 }
 0x4b9   :  { %v2260_v5 = vsel %vm2198_vm13, %v2229_v44, 0.0  ;;  %v1727_v28 = vadd.f32 %v4129_v42, %v1541_v29  ;;  %v1990_v42 = vxor.u32 %v1959_v54, %v1928_v15  ;;  %v2022_v55 = vmul.u32 2146121005, %v1991_v10 }
 0x4ba   :  { %2291 = vst [vmem:[#allocation3 + $0x48] sm:$0xff] %v2260_v5  ;;  %v1622_v13 = vpop.permute.xlu1 %1621  ;;  %v1446_v37 = vpop.permute.xlu0 %1445  ;;  %v1868_v26 = vadd.s32 %v1837_v35, %v4058_v20  ;;  %v2113_v44 = vmul.u32 2221713035, %v4207_v27  ;;  %v2141_v11 = vshrl.u32 %v2110_v18, 16  ;;  %v4221_v29 = vxor.u32 %v2050_v48, %v2019_v56 }
 0x4bb   :  { %v1758_v9 = vmax.f32 %v1727_v28, 0.0  ;;  %v1730_v0 = vadd.f32 %v1622_v13, %v1544_v30  ;;  %v2021_v34 = vmul.u32 2146121005, %v1990_v42  ;;  %v1840_v51 = vmul.u32 128, %v1807_v23 }
 0x4bc   :  { %v1546_v54 = vmul.f32 %v1446_v37, %v3382_v25  ;;  %v1993_v12 = vxor.u32 %v1962_v2, %v1931_v63  ;;  %v1992_v13 = vxor.u32 %v1961_v39, %v1930_v46  ;;  %v1964_v10 = vshrl.u32 %v1933_v43, 16 }
 0x4bd   :  { %v2228_v36 = vmul.f32 1.1111112, %v1758_v9  ;;  %v1761_v57 = vmax.f32 %v1730_v0, 0.0  ;;  %v1899_v45 = vmul.u32 2654435769, %v1868_v26  ;;  %v2144_v4 = vshrl.u32 %v2113_v44, 16 }
 0x4be   :  { %v1431_v3 = vpop.permute.xlu1 %1430  ;;  %v4213_v22 = vpop.permute.xlu0 %1646  ;;  %vm2201_vm2 = vcmp.ge.u32.totalorder %v4205_v58, 429496729  ;;  %v2112_v25 = vmul.u32 2221713035, %v4221_v29  ;;  %v1871_v63 = vadd.s32 %v1840_v51, %v4058_v20  ;;  %v4232_v0 = vxor.u32 %v2141_v11, %v2110_v18 }
 0x4bf   :  { %v2259_v62 = vsel %vm2197_vm14, %v2228_v36, 0.0  ;;  %v2231_v15 = vmul.f32 1.1111112, %v1761_v57  ;;  %v1543_v52 = vmul.f32 %v1431_v3, %v3370_v17  ;;  %v2053_v17 = vshrl.u32 %v2022_v55, 15 }
 0x4c0   :  { %2290 = vst [vmem:[#allocation3 + $0x40] sm:$0xff] %v2259_v62  ;;  %v2024_v46 = vmul.u32 2146121005, %v1993_v12  ;;  %vm2204_vm3 = vcmp.ge.u32.totalorder %v4211_v47, 429496729  ;;  %v1995_v36 = vxor.u32 %v1964_v10, %v1933_v43  ;;  %v1932_v57 = vadd.s32 %v4070_v41, %v1899_v45 }
 0x4c1   :  { %v2262_v6 = vsel %vm2200_vm15, %v2231_v15, 0.0  ;;  %v1729_v5 = vadd.f32 %v4143_v21, %v1543_v52  ;;  %v2052_v21 = vshrl.u32 %v2021_v34, 15  ;;  %v2084_v42 = vxor.u32 %v2053_v17, %v2022_v55 }
 0x4c2   :  { %2293 = vst [vmem:[#allocation3 + $0x58] sm:$0xff] %v2262_v6  ;;  %v1632_v30 = vpop.permute.xlu1 %1631  ;;  %v1456_v28 = vpop.permute.xlu0 %1455  ;;  %v2023_v23 = vmul.u32 2146121005, %v1992_v13  ;;  %v1806_v18 = vadd.s32 192, %v4054_v53  ;;  %v2143_v26 = vshrl.u32 %v2112_v25, 16  ;;  %v1809_v52 = vadd.s32 216, %v4054_v53 }
 0x4c3   :  { %v1760_v56 = vmax.f32 %v1729_v5, 0.0  ;;  %v1732_v35 = vadd.f32 %v1632_v30, %v1546_v54  ;;  %v4242_v62 = vxor.u32 %v2052_v21, %v2021_v34  ;;  %v1902_v15 = vmul.u32 2654435769, %v1871_v63 }
 0x4c4   :  { %v1548_v43 = vmul.f32 %v1456_v28, %v3391_v32  ;;  %v2055_v11 = vshrl.u32 %v2024_v46, 15  ;;  %v2115_v51 = vmul.u32 2221713035, %v2084_v42  ;;  %v2054_v6 = vshrl.u32 %v2023_v23, 15 }
 0x4c5   :  { %v2230_v37 = vmul.f32 1.1111112, %v1760_v56  ;;  %v1763_v9 = vmax.f32 %v1732_v35, 0.0  ;;  %v2026_v54 = vmul.u32 2146121005, %v1995_v36  ;;  %v1963_v5 = vshrl.u32 %v1932_v57, 16 }
 0x4c6   :  { %v1441_v27 = vpop.permute.xlu1 %1440  ;;  %v4234_v48 = vpop.permute.xlu0 %1656  ;;  %v4249_v30 = vxor.u32 %v2144_v4, %v2113_v44  ;;  %v1839_v17 = vmul.u32 128, %v1806_v18  ;;  %vm2203_vm4 = vcmp.ge.u32.totalorder %v4232_v0, 429496729  ;;  %v2114_v33 = vmul.u32 2221713035, %v4242_v62 }
 0x4c7   :  { %v2261_v2 = vsel %vm2199_vm0, %v2230_v37, 0.0  ;;  %v2233_v3 = vmul.f32 1.1111112, %v1763_v9  ;;  %v1545_v39 = vmul.f32 %v1441_v27, %v3379_v24  ;;  %v1935_v32 = vadd.s32 %v4070_v41, %v1902_v15 }
 0x4c8   :  { %2292 = vst [vmem:[#allocation3 + $0x50] sm:$0xff] %v2261_v2  ;;  %v4254_v10 = vxor.u32 %v2143_v26, %v2112_v25  ;;  %v4256_v45 = vxor.u32 %v2055_v11, %v2024_v46  ;;  %v2146_v21 = vshrl.u32 %v2115_v51, 16  ;;  %v4260_v44 = vxor.u32 %v2054_v6, %v2023_v23 }
 0x4c9   :  { %v2264_v55 = vsel %vm2202_vm1, %v2233_v3, 0.0  ;;  %v1731_v14 = vadd.f32 %v4168_v1, %v1545_v39  ;;  %v1842_v1 = vmul.u32 128, %v1809_v52  ;;  %v2057_v4 = vshrl.u32 %v2026_v54, 15 }
 0x4ca   :  { %2295 = vst [vmem:[#allocation3 + $0x68] sm:$0xff] %v2264_v55  ;;  %v1642_v29 = vpop.permute.xlu1 %1641  ;;  %v1466_v24 = vpop.permute.xlu0 %1465  ;;  %v4262_v63 = vxor.u32 %v1963_v5, %v1932_v57  ;;  %v1870_v25 = vadd.s32 %v1839_v17, %v4058_v20  ;;  %v2145_v46 = vshrl.u32 %v2114_v33, 16  ;;  %v1966_v42 = vshrl.u32 %v1935_v32, 16 }
 0x4cb   :  { %v1762_v34 = vmax.f32 %v1731_v14, 0.0  ;;  %v1734_v12 = vadd.f32 %v1642_v29, %v1548_v43  ;;  %v1873_v36 = vadd.s32 %v1842_v1, %v4058_v20  ;;  %v1808_v2 = vadd.s32 208, %v4054_v53 }
 0x4cc   :  { %v1550_v57 = vmul.f32 %v1466_v24, %v3400_v40  ;;  %v2117_v3 = vmul.u32 2221713035, %v4256_v45  ;;  %v4275_v18 = vxor.u32 %v2146_v21, %v2115_v51  ;;  %v2116_v26 = vmul.u32 2221713035, %v4260_v44 }
 0x4cd   :  { %v2232_v28 = vmul.f32 1.1111112, %v1762_v34  ;;  %v1765_v13 = vmax.f32 %v1734_v12, 0.0  ;;  %v4278_v62 = vxor.u32 %v2057_v4, %v2026_v54  ;;  %v2025_v15 = vmul.u32 2146121005, %v4262_v63 }
 0x4ce   :  { %v1451_v56 = vpop.permute.xlu1 %1450  ;;  %v4258_v35 = vpop.permute.xlu0 %1666  ;;  %vm2206_vm5 = vcmp.ge.u32.totalorder %v4249_v30, 429496729  ;;  %v1901_v40 = vmul.u32 2654435769, %v1870_v25  ;;  %vm2205_vm6 = vcmp.ge.u32.totalorder %v4254_v10, 429496729  ;;  %v4286_v24 = vxor.u32 %v2145_v46, %v2114_v33 }
 0x4cf   :  { %v2263_v37 = vsel %vm2201_vm2, %v2232_v28, 0.0  ;;  %v2235_v9 = vmul.f32 1.1111112, %v1765_v13  ;;  %v1547_v27 = vmul.f32 %v1451_v56, %v3388_v31  ;;  %v1904_v55 = vmul.u32 2654435769, %v1873_v36 }
 0x4d0   :  { %2294 = vst [vmem:[#allocation3 + $0x60] sm:$0xff] %v2263_v37  ;;  %v1841_v43 = vmul.u32 128, %v1808_v2  ;;  %v1810_v14 = vadd.s32 224, %v4054_v53  ;;  %v1815_v51 = vmul.u32 128, %v4054_v53  ;;  %vm2208_vm7 = vcmp.ge.u32.totalorder %v4275_v18, 429496729 }
 0x4d1   :  { %v2266_v23 = vsel %vm2204_vm3, %v2235_v9, 0.0  ;;  %v1733_v58 = vadd.f32 %v4189_v59, %v1547_v27  ;;  %v4283_v59 = vxor.u32 %v1966_v42, %v1935_v32  ;;  %v2148_v5 = vshrl.u32 %v2117_v3, 16 }
 0x4d2   :  { %2297 = vst [vmem:[#allocation3 + $0x78] sm:$0xff] %v2266_v23  ;;  %v1652_v31 = vpop.permute.xlu1 %1651  ;;  %v1476_v39 = vpop.permute.xlu0 %1475  ;;  %v2147_v34 = vshrl.u32 %v2116_v26, 16  ;;  %v2119_v12 = vmul.u32 2221713035, %v4278_v62  ;;  %v2056_v17 = vshrl.u32 %v2025_v15, 15  ;;  %v1934_v33 = vadd.s32 %v4070_v41, %v1901_v40 }
 0x4d3   :  { %v1764_v52 = vmax.f32 %v1733_v58, 0.0  ;;  %v1736_v47 = vadd.f32 %v1652_v31, %v1550_v57  ;;  %v2028_v13 = vmul.u32 2146121005, %v4283_v59  ;;  %v1937_v45 = vadd.s32 %v4070_v41, %v1904_v55 }
 0x4d4   :  { %v1872_v56 = vadd.s32 %v1841_v43, %v4058_v20  ;;  %v1843_v21 = vmul.u32 128, %v1810_v14  ;;  %v1552_v4 = vmul.f32 %v1476_v39, %v3409_v50  ;;  %v1846_v63 = vadd.s32 %v1815_v51, %v4058_v20 }
 0x4d5   :  { %v2234_v11 = vmul.f32 1.1111112, %v1764_v52  ;;  %v1767_v29 = vmax.f32 %v1736_v47, 0.0  ;;  %v4305_v9 = vxor.u32 %v2148_v5, %v2117_v3  ;;  %v2150_v27 = vshrl.u32 %v2119_v12, 16 }
 0x4d6   :  { %v1461_v6 = vpop.permute.xlu1 %1460  ;;  %v4289_v54 = vpop.permute.xlu0 %1676  ;;  %v1783_v25 = vadd.s32 8, %v4054_v53  ;;  %v1784_v46 = vadd.s32 16, %v4054_v53  ;;  %v4311_v36 = vxor.u32 %v2147_v34, %v2116_v26  ;;  %v1965_v50 = vshrl.u32 %v1934_v33, 16 }
 0x4d7   :  { %v2265_v32 = vsel %vm2203_vm4, %v2234_v11, 0.0  ;;  %v2237_v1 = vmul.f32 1.1111112, %v1767_v29  ;;  %v1549_v28 = vmul.f32 %v1461_v6, %v3397_v38  ;;  %vm2207_vm8 = vcmp.ge.u32.totalorder %v4286_v24, 429496729 }
 0x4d8   :  { %2296 = vst [vmem:[#allocation3 + $0x70] sm:$0xff] %v2265_v32  ;;  %v1968_v2 = vshrl.u32 %v1937_v45, 16  ;;  %v1903_v23 = vmul.u32 2654435769, %v1872_v56  ;;  %v1874_v57 = vadd.s32 %v1843_v21, %v4058_v20  ;;  %v2059_v31 = vshrl.u32 %v2028_v13, 15 }
 0x4d9   :  { %v2268_v44 = vsel %vm2206_vm5, %v2237_v1, 0.0  ;;  %v1735_v0 = vadd.f32 %v4213_v22, %v1549_v28  ;;  %v4314_v22 = vxor.u32 %v2056_v17, %v2025_v15  ;;  %v1877_v39 = vmul.u32 2654435769, %v1846_v63 }
 0x4da   :  { %2299 = vst [vmem:[#allocation3 + $0x88] sm:$0xff] %v2268_v44  ;;  %v1662_v38 = vpop.permute.xlu1 %1661  ;;  %v1486_v37 = vpop.permute.xlu0 %1485  ;;  %vm2210_vm9 = vcmp.ge.u32.totalorder %v4305_v9, 429496729  ;;  %v1816_v26 = vmul.u32 128, %v1783_v25  ;;  %v1817_v40 = vmul.u32 128, %v1784_v46  ;;  %v1811_v59 = vadd.s32 232, %v4054_v53 }
 0x4db   :  { %v1766_v30 = vmax.f32 %v1735_v0, 0.0  ;;  %v1738_v42 = vadd.f32 %v1662_v38, %v1552_v4  ;;  %v1812_v15 = vadd.s32 240, %v4054_v53  ;;  %v1996_v11 = vxor.u32 %v1965_v50, %v1934_v33 }
 0x4dc   :  { %v2118_v29 = vmul.u32 2221713035, %v4314_v22  ;;  %v1999_v51 = vxor.u32 %v1968_v2, %v1937_v45  ;;  %v1936_v6 = vadd.s32 %v4070_v41, %v1903_v23  ;;  %v1905_v5 = vmul.u32 2654435769, %v1874_v57 }
 0x4dd   :  { %v2236_v58 = vmul.f32 1.1111112, %v1766_v30  ;;  %v1769_v3 = vmax.f32 %v1738_v42, 0.0  ;;  %v1554_v17 = vmul.f32 %v1486_v37, %v3418_v61  ;;  %v1910_v10 = vadd.s32 %v4070_v41, %v1877_v39 }
 0x4de   :  { %v1471_v52 = vpop.permute.xlu1 %1470  ;;  %v4317_v47 = vpop.permute.xlu0 %1686  ;;  %v1847_v1 = vadd.s32 %v1816_v26, %v4058_v20  ;;  %v1848_v28 = vadd.s32 %v1817_v40, %v4058_v20  ;;  %v1844_v33 = vmul.u32 128, %v1811_v59  ;;  %v1845_v45 = vmul.u32 128, %v1812_v15 }
 0x4df   :  { %v2267_v55 = vsel %vm2205_vm6, %v2236_v58, 0.0  ;;  %v2239_v43 = vmul.f32 1.1111112, %v1769_v3  ;;  %v1551_v14 = vmul.f32 %v1471_v52, %v3406_v49  ;;  %v4336_v18 = vxor.u32 %v2150_v27, %v2119_v12 }
 0x4e0   :  { %2298 = vst [vmem:[#allocation3 + $0x80] sm:$0xff] %v2267_v55  ;;  %v2027_v61 = vmul.u32 2146121005, %v1996_v11  ;;  %vm2209_vm10 = vcmp.ge.u32.totalorder %v4311_v36, 429496729  ;;  %v1967_v4 = vshrl.u32 %v1936_v6, 16  ;;  %v1938_v0 = vadd.s32 %v4070_v41, %v1905_v5 }
 0x4e1   :  { %v2270_v34 = vsel %vm2208_vm7, %v2239_v43, 0.0  ;;  %v1737_v53 = vadd.f32 %v4234_v48, %v1551_v14  ;;  %v2090_v48 = vxor.u32 %v2059_v31, %v2028_v13  ;;  %v2030_v44 = vmul.u32 2146121005, %v1999_v51 }
 0x4e2   :  { %2301 = vst [vmem:[#allocation3 + $0x98] sm:$0xff] %v2270_v34  ;;  %v1672_v32 = vpop.permute.xlu1 %1671  ;;  %v1496_v49 = vpop.permute.xlu0 %1495  ;;  %v2149_v37 = vshrl.u32 %v2118_v29, 16  ;;  %v1941_v25 = vshrl.u32 %v1910_v10, 16  ;;  %v1878_v62 = vmul.u32 2654435769, %v1847_v1  ;;  %v1875_v27 = vadd.s32 %v1844_v33, %v4058_v20 }
 0x4e3   :  { %v1768_v56 = vmax.f32 %v1737_v53, 0.0  ;;  %v1740_v21 = vadd.f32 %v1672_v32, %v1554_v17  ;;  %v1879_v12 = vmul.u32 2654435769, %v1848_v28  ;;  %v1876_v42 = vadd.s32 %v1845_v45, %v4058_v20 }
 0x4e4   :  { %v2058_v23 = vshrl.u32 %v2027_v61, 15  ;;  %v2121_v57 = vmul.u32 2221713035, %v2090_v48  ;;  %v2061_v58 = vshrl.u32 %v2030_v44, 15  ;;  %v1998_v3 = vxor.u32 %v1967_v4, %v1936_v6 }
 0x4e5   :  { %v2238_v63 = vmul.f32 1.1111112, %v1768_v56  ;;  %v1771_v38 = vmax.f32 %v1740_v21, 0.0  ;;  %v1969_v31 = vshrl.u32 %v1938_v0, 16  ;;  %v1556_v52 = vmul.f32 %v1496_v49, %v3427_v8 }
 0x4e6   :  { %v1481_v46 = vpop.permute.xlu1 %1480  ;;  %v4342_v30 = vpop.permute.xlu0 %1696  ;;  %v1972_v20 = vxor.u32 %v1941_v25, %v1910_v10  ;;  %v1911_v59 = vadd.s32 %v4070_v41, %v1878_v62  ;;  %v1906_v15 = vmul.u32 2654435769, %v1875_v27  ;;  %v1907_v55 = vmul.u32 2654435769, %v1876_v42 }
 0x4e7   :  { %v2269_v13 = vsel %vm2207_vm8, %v2238_v63, 0.0  ;;  %v2241_v50 = vmul.f32 1.1111112, %v1771_v38  ;;  %v1553_v2 = vmul.f32 %v1481_v46, %v3415_v60  ;;  %v1912_v60 = vadd.s32 %v4070_v41, %v1879_v12 }
 0x4e8   :  { %2300 = vst [vmem:[#allocation3 + $0x90] sm:$0xff] %v2269_v13  ;;  %vm2212_vm11 = vcmp.ge.u32.totalorder %v4336_v18, 429496729  ;;  %v2089_v9 = vxor.u32 %v2058_v23, %v2027_v61  ;;  %v2152_v11 = vshrl.u32 %v2121_v57, 16  ;;  %v2092_v51 = vxor.u32 %v2061_v58, %v2030_v44 }
 0x4e9   :  { %v2272_v39 = vsel %vm2210_vm9, %v2241_v50, 0.0  ;;  %v1739_v26 = vadd.f32 %v4258_v35, %v1553_v2  ;;  %v2029_v8 = vmul.u32 2146121005, %v1998_v3  ;;  %v2000_v6 = vxor.u32 %v1969_v31, %v1938_v0 }
 0x4ea   :  { %2303 = vst [vmem:[#allocation3 + $0xa8] sm:$0xff] %v2272_v39  ;;  %v1682_v24 = vpop.permute.xlu1 %1681  ;;  %v1506_v40 = vpop.permute.xlu0 %1505  ;;  %v2180_v34 = vxor.u32 %v2149_v37, %v2118_v29  ;;  %v2003_v17 = vmul.u32 2146121005, %v1972_v20  ;;  %v1942_v10 = vshrl.u32 %v1911_v59, 16  ;;  %v1943_v32 = vshrl.u32 %v1912_v60, 16 }
 0x4eb   :  { %v1770_v43 = vmax.f32 %v1739_v26, 0.0  ;;  %v1742_v14 = vadd.f32 %v1682_v24, %v1556_v52  ;;  %v1939_v49 = vadd.s32 %v4070_v41, %v1906_v15  ;;  %v1940_v1 = vadd.s32 %v4070_v41, %v1907_v55 }
 0x4ec   :  { %v2120_v56 = vmul.u32 2221713035, %v2089_v9  ;;  %v2183_v22 = vxor.u32 %v2152_v11, %v2121_v57  ;;  %v2123_v29 = vmul.u32 2221713035, %v2092_v51  ;;  %v2060_v61 = vshrl.u32 %v2029_v8, 15 }
 0x4ed   :  { %v2240_v35 = vmul.f32 1.1111112, %v1770_v43  ;;  %v1773_v5 = vmax.f32 %v1742_v14, 0.0  ;;  %v2031_v48 = vmul.u32 2146121005, %v2000_v6  ;;  %v1558_v4 = vmul.f32 %v1506_v40, %v3436_v19 }
 0x4ee   :  { %v1491_v53 = vpop.permute.xlu1 %1490  ;;  %v4363_v21 = vpop.permute.xlu0 %1706  ;;  %v2034_v36 = vshrl.u32 %v2003_v17, 15  ;;  %v1973_v63 = vxor.u32 %v1942_v10, %v1911_v59  ;;  %v1970_v38 = vshrl.u32 %v1939_v49, 16  ;;  %v1971_v37 = vshrl.u32 %v1940_v1, 16  ;;  %v4429_v59 = vld [vmem:[#allocation10_spill] sm:$0xff] }
 0x4ef   :  { %v2271_v28 = vsel %vm2209_vm10, %v2240_v35, 0.0  ;;  %v2243_v33 = vmul.f32 1.1111112, %v1773_v5  ;;  %v1555_v45 = vmul.f32 %v1491_v53, %v3424_v7  ;;  %v1974_v7 = vxor.u32 %v1943_v32, %v1912_v60 }
 0x4f0   :  { %2302 = vst [vmem:[#allocation3 + $0xa0] sm:$0xff] %v2271_v28  ;;  %vm2211_vm12 = vcmp.ge.u32.totalorder %v2180_v34, 429496729  ;;  %v2151_v62 = vshrl.u32 %v2120_v56, 16  ;;  %v2154_v12 = vshrl.u32 %v2123_v29, 16  ;;  %v2091_v27 = vxor.u32 %v2060_v61, %v2029_v8  ;;  %v4431_v61 = vld [vmem:[#allocation6_spill] sm:$0xff] }
 0x4f1   :  { %v2274_v44 = vsel %vm2212_vm11, %v2243_v33, 0.0  ;;  %v1741_v41 = vadd.f32 %v4289_v54, %v1555_v45  ;;  %v2062_v42 = vshrl.u32 %v2031_v48, 15  ;;  %vm2214_vm13 = vcmp.ge.u32.totalorder %v2183_v22, 429496729  ;;  %v4430_v45 = vld [vmem:[#allocation9_spill] sm:$0xff] }
 0x4f2   :  { %2305 = vst [vmem:[#allocation3 + $0xb8] sm:$0xff] %v2274_v44  ;;  %v1692_v0 = vpop.permute.xlu1 %1691  ;;  %v2065_v19 = vxor.u32 %v2034_v36, %v2003_v17  ;;  %v1516_v50 = vpop.permute.xlu0 %1515  ;;  %v2004_v2 = vmul.u32 2146121005, %v1973_v63  ;;  %v2005_v23 = vmul.u32 2146121005, %v1974_v7  ;;  %v2001_v57 = vxor.u32 %v1970_v38, %v1939_v49 }
 0x4f3   :  { %v1772_v25 = vmax.f32 %v1741_v41, 0.0  ;;  %v1744_v46 = vadd.f32 %v1692_v0, %v1558_v4  ;;  %v2002_v58 = vxor.u32 %v1971_v37, %v1940_v1  ;;  %v2182_v52 = vxor.u32 %v2151_v62, %v2120_v56  ;;  %v4433_v62 = vld [vmem:[#allocation11_spill] sm:$0xff] }
 0x4f4   :  { %v2185_v26 = vxor.u32 %v2154_v12, %v2123_v29  ;;  %v2122_v20 = vmul.u32 2221713035, %v2091_v27  ;;  %v2093_v24 = vxor.u32 %v2062_v42, %v2031_v48  ;;  %v1560_v60 = vmul.f32 %v1516_v50, %v4429_v59  ;;  %v4432_v48 = vld [vmem:[#allocation15_spill] sm:$0xff] }
 0x4f5   :  { %v2242_v18 = vmul.f32 1.1111112, %v1772_v25  ;;  %v1775_v13 = vmax.f32 %v1744_v46, 0.0  ;;  %v2096_v55 = vmul.u32 2221713035, %v2065_v19  ;;  %v2035_v14 = vshrl.u32 %v2004_v2, 15 }
 0x4f6   :  { %v1501_v54 = vpop.permute.xlu1 %1500  ;;  %v2036_v9 = vshrl.u32 %v2005_v23, 15  ;;  %v2032_v11 = vmul.u32 2146121005, %v2001_v57  ;;  %v2033_v51 = vmul.u32 2146121005, %v2002_v58  ;;  %v2153_v6 = vshrl.u32 %v2122_v20, 16 }
 0x4f7   :  { %v2273_v3 = vsel %vm2211_vm12, %v2242_v18, 0.0  ;;  %v2245_v31 = vmul.f32 1.1111112, %v1775_v13  ;;  %v1557_v39 = vmul.f32 %v1501_v54, %v3433_v16  ;;  %vm2213_vm14 = vcmp.ge.u32.totalorder %v2182_v52, 429496729 }
 0x4f8   :  { %2304 = vst [vmem:[#allocation3 + $0xb0] sm:$0xff] %v2273_v3  ;;  %v2124_v35 = vmul.u32 2221713035, %v2093_v24  ;;  %vm2216_vm15 = vcmp.ge.u32.totalorder %v2185_v26, 429496729  ;;  %v2127_v17 = vshrl.u32 %v2096_v55, 16  ;;  %v2066_v32 = vxor.u32 %v2035_v14, %v2004_v2 }
 0x4f9   :  { %v2276_v40 = vsel %vm2214_vm13, %v2245_v31, 0.0  ;;  %v1743_v15 = vadd.f32 %v4317_v47, %v1557_v39  ;;  %v2067_v47 = vxor.u32 %v2036_v9, %v2005_v23  ;;  %v2063_v49 = vshrl.u32 %v2032_v11, 15  ;;  %v4434_v31 = vld [vmem:[#allocation7_spill] sm:$0xff]  ;;  %v4435_v39 = vld [vmem:[#allocation14_spill] sm:$0xff]  ;;  %v4436_v26 = vld [vmem:[#allocation8_spill] sm:$0xff] }
 0x4fa   :  { %2307 = vst [vmem:[#allocation3 + $0xc8] sm:$0xff] %v2276_v40  ;;  %v1702_v43 = vpop.permute.xlu1 %1701  ;;  %v1526_v53 = vpop.permute.xlu0 %1525  ;;  %v2064_v1 = vshrl.u32 %v2033_v51, 15  ;;  %v2184_v22 = vxor.u32 %v2153_v6, %v2122_v20  ;;  %v2155_v29 = vshrl.u32 %v2124_v35, 16  ;;  %v1533_v44 = vmul.f32 %v4432_v48, %v4431_v61  ;;  %v4437_v20 = vld [vmem:[#allocation16_spill] sm:$0xff]  ;;  %v4439_v6 = vld [vmem:[#allocation13_spill] sm:$0xff] }
 0x4fb   :  { %v1774_v8 = vmax.f32 %v1743_v15, 0.0  ;;  %v1746_v16 = vadd.f32 %v1702_v43, %v1560_v60  ;;  %v2158_v36 = vxor.u32 %v2127_v17, %v2096_v55  ;;  %v2097_v7 = vmul.u32 2221713035, %v2066_v32 }
 0x4fc   :  { %v2098_v38 = vmul.u32 2221713035, %v2067_v47  ;;  %v2094_v37 = vxor.u32 %v2063_v49, %v2032_v11  ;;  %v2095_v25 = vxor.u32 %v2064_v1, %v2033_v51  ;;  %vm2215_vm0 = vcmp.ge.u32.totalorder %v2184_v22, 429496729 }
 0x4fd   :  { %v2244_v5 = vmul.f32 1.1111112, %v1774_v8  ;;  %v1777_v34 = vmax.f32 %v1746_v16, 0.0  ;;  %v2186_v42 = vxor.u32 %v2155_v29, %v2124_v35  ;;  %vm2189_vm1 = vcmp.ge.u32.totalorder %v2158_v36, 429496729  ;;  %v4438_v8 = vld [vmem:[#allocation12_spill] sm:$0xff] }
 0x4fe   :  { %v1511_v10 = vpop.permute.xlu1 %1510  ;;  %v2128_v50 = vshrl.u32 %v2097_v7, 16  ;;  %v2129_v54 = vshrl.u32 %v2098_v38, 16  ;;  %v2125_v2 = vmul.u32 2221713035, %v2094_v37  ;;  %v2126_v23 = vmul.u32 2221713035, %v2095_v25 }
 0x4ff   :  { %v2275_v28 = vsel %vm2213_vm14, %v2244_v5, 0.0  ;;  %v2247_v33 = vmul.f32 1.1111112, %v1777_v34  ;;  %v1559_v56 = vmul.f32 %v1511_v10, %v4430_v45  ;;  %vm2217_vm2 = vcmp.ge.u32.totalorder %v2186_v42, 429496729 }
 0x500   :  { %2306 = vst [vmem:[#allocation3 + $0xc0] sm:$0xff] %v2275_v28  ;;  %v1534_v52 = vmul.f32 %v4435_v39, %v4434_v31  ;;  %v1535_v24 = vmul.f32 %v4437_v20, %v4436_v26  ;;  %v2159_v59 = vxor.u32 %v2128_v50, %v2097_v7  ;;  %v2160_v15 = vxor.u32 %v2129_v54, %v2098_v38 }
 0x501   :  { %v2278_v4 = vsel %vm2216_vm15, %v2247_v33, 0.0  ;;  %v1745_v41 = vadd.f32 %v4342_v30, %v1559_v56  ;;  %v2156_v43 = vshrl.u32 %v2125_v2, 16  ;;  %v2157_v14 = vshrl.u32 %v2126_v23, 16 }
 0x502   :  { %2309 = vst [vmem:[#allocation3 + $0xd8] sm:$0xff] %v2278_v4  ;;  %v1521_v0 = vpop.permute.xlu1 %1520  ;;  %v1567_v63 = vpop.permute.xlu0 %1566  ;;  %v1562_v16 = vmul.f32 %v1526_v53, %v4438_v8  ;;  %vm2190_vm3 = vcmp.ge.u32.totalorder %v2159_v59, 429496729  ;;  %vm2191_vm4 = vcmp.ge.u32.totalorder %v2160_v15, 429496729 }
 0x503   :  { %v1776_v46 = vmax.f32 %v1745_v41, 0.0  ;;  %v1561_v12 = vmul.f32 %v1521_v0, %v4433_v62  ;;  %v1719_v27 = vadd.f32 %v1567_v63, %v1533_v44  ;;  %v2187_v17 = vxor.u32 %v2156_v43, %v2125_v2 }
 0x504   :  { %v2188_v32 = vxor.u32 %v2157_v14, %v2126_v23 }
 0x505   :  { %v2246_v18 = vmul.f32 1.1111112, %v1776_v46  ;;  %v1747_v13 = vadd.f32 %v4363_v21, %v1561_v12  ;;  %v1750_v19 = vmax.f32 %v1719_v27, 0.0  ;;  %vm2218_vm5 = vcmp.ge.u32.totalorder %v2187_v17, 429496729 }
 0x506   :  { %v1531_v30 = vpop.permute.xlu1 %1530  ;;  %vm2219_vm6 = vcmp.ge.u32.totalorder %v2188_v32, 429496729 }
 0x507   :  { %v2277_v57 = vsel %vm2215_vm0, %v2246_v18, 0.0  ;;  %v1778_v58 = vmax.f32 %v1747_v13, 0.0  ;;  %v2220_v3 = vmul.f32 1.1111112, %v1750_v19  ;;  %v1563_v35 = vmul.f32 %v1531_v30, %v4439_v6 }
 0x508   :  { %2308 = vst [vmem:[#allocation3 + $0xd0] sm:$0xff] %v2277_v57 }
 0x509   :  { %v2248_v40 = vmul.f32 1.1111112, %v1778_v58  ;;  %v2251_v21 = vsel %vm2189_vm1, %v2220_v3, 0.0 }
 0x50a   :  { %2282 = vst [vmem:[#allocation3] sm:$0xff] %v2251_v21  ;;  %v1572_v60 = vpop.permute.xlu1 %1571  ;;  %v1577_v55 = vpop.permute.xlu0 %1576 }
 0x50b   :  { %v2279_v9 = vsel %vm2217_vm2, %v2248_v40, 0.0  ;;  %v1720_v11 = vadd.f32 %v1572_v60, %v1534_v52  ;;  %v1721_v51 = vadd.f32 %v1577_v55, %v1535_v24 }
 0x50c   :  { %2310 = vst [vmem:[#allocation3 + $0xe0] sm:$0xff] %v2279_v9 }
 0x50d   :  { %v1751_v5 = vmax.f32 %v1720_v11, 0.0  ;;  %v1752_v34 = vmax.f32 %v1721_v51, 0.0 }
 0x50e   :  { %v1712_v10 = vpop.permute.xlu1 %1711  ;;  %v1717_v47 = vpop.permute.xlu0 %1716 }
 0x50f   :  { %v2221_v49 = vmul.f32 1.1111112, %v1751_v5  ;;  %v2222_v1 = vmul.f32 1.1111112, %v1752_v34  ;;  %v1748_v28 = vadd.f32 %v1712_v10, %v1562_v16  ;;  %v1749_v33 = vadd.f32 %v1717_v47, %v1563_v35 }
 0x511   :  { %v2252_v45 = vsel %vm2190_vm3, %v2221_v49, 0.0  ;;  %v2253_v56 = vsel %vm2191_vm4, %v2222_v1, 0.0  ;;  %v1779_v22 = vmax.f32 %v1748_v28, 0.0  ;;  %v1780_v53 = vmax.f32 %v1749_v33, 0.0 }
 0x512   :  { %2283 = vst [vmem:[#allocation3 + $0x8] sm:$0xff] %v2252_v45  ;;  %2284 = vst [vmem:[#allocation3 + $0x10] sm:$0xff] %v2253_v56 }
 0x513   :  { %v2249_v29 = vmul.f32 1.1111112, %v1779_v22  ;;  %v2250_v61 = vmul.f32 1.1111112, %v1780_v53 }
 0x515   :  { %v2280_v48 = vsel %vm2218_vm5, %v2249_v29, 0.0  ;;  %v2281_v44 = vsel %vm2219_vm6, %v2250_v61, 0.0 }
 0x516   :  { %2311 = vst [vmem:[#allocation3 + $0xe8] sm:$0xff] %v2280_v48  ;;  %2312 = vst [vmem:[#allocation3 + $0xf0] sm:$0xf] %v2281_v44 }
 0x517   :  { %3042 = shalt.err (!%p3039_p4)
}
 0x518   :  { %s3043_s26 = scalar_lea.hbm %s4407_s8, 3968 }
 0x519   :  { %p3044_p5 = scmp.ne.s32.totalorder %s4407_s8, %s3043_s26  ;;  %p3047_p6 = scmp.lt.u32.totalorder %s3043_s26, %s4407_s8 }
 0x51b   :  { %p3049_p7 = pnand %p3047_p6, %p3044_p5 }
 0x51d   :  { %3052 = shalt.err (!%p3049_p7)
}
 0x51e   :  { %s3061_s9 = smov 128   ;;  %s3062_s1 = smov 8  }
 0x51f   :  { %2324 = dma.vmem_to_hbm [thread:$0]  %s2319_s22, 3968, %s4407_s8, [#allocation4], %s3061_s9, %s3061_s9, %s3062_s1  }
 0x520   :  { %3053 = dma.done.wait [#allocation4], 3968  }
 0x521   :  { %3054 = vsyncadd [#allocation4], 4294963328 }
 0x522   :  { %2328 = vsyncpa [#allocation4], 1 }

</bundles_post_ra>
